<compile_context>
chip_gen: v5e
topology: v5e:2x2
jax: 0.10.0
libtpu: 0.0.40
codegen_flags: <defaults>
</compile_context>

<pallas_src>
import numpy as np

import jax
import jax.numpy as jnp
from jax import lax
from jax.experimental import pallas as pl
from jax.experimental.pallas import tpu as pltpu


# --------------------------------------------------------------------------- #
# ConvTranspose2d(k=4, s=2, p=1) tap decomposition.
#
#   oh = 2*ih + kh - 1  =>  oh = 2*m + ph :  ph=0: (ih=m, kh=1), (ih=m-1, kh=3)
#                                            ph=1: (ih=m, kh=2), (ih=m+1, kh=0)
#   (identical decomposition along width with kw / pw / iw)
#
# The four (ph, dh=ih-m) combinations below are the four matmuls the kernel
# performs per row block.
_PH_DH_KH = ((0, -1, 3), (0, 0, 1), (1, 0, 2), (1, +1, 0))


def _width_selection_tensor(width):
    """T[t, iw, ow, kh, kw] = 1 where input column iw feeds output column ow
    through kernel tap (kh, kw), for combination t of _PH_DH_KH.  The width
    zero-padding (p=1) is folded in here: out-of-range iw are simply dropped."""
    t_sel = np.zeros((4, width, 2 * width, 4, 4), np.float32)
    for t, (_ph, _dh, kh) in enumerate(_PH_DH_KH):
        for wc in range(width):
            for pw in range(2):
                ow = 2 * wc + pw
                for iw in ((wc - 1, wc) if pw == 0 else (wc, wc + 1)):
                    if 0 <= iw < width:
                        kw = 2 * (wc - iw) + pw + 1
                        t_sel[t, iw, ow, kh, kw] = 1.0
    return t_sel


def _banded_weights(w, width, dtype):
    """PyTorch ConvTranspose2d weight (Cin, Cout, 4, 4) -> (4, W*Cin, 2W*Cout)
    band matrices, one per (output-row-parity, input-row-offset) combination.
    Row index: iw*Cin + ci ; column index: ow*Cout + co (both lane-dense)."""
    cin, cout = w.shape[0], w.shape[1]
    t_sel = jnp.asarray(_width_selection_tensor(width), jnp.float32)
    wb = jnp.einsum('tiokl,cdkl->ticod', t_sel, w.astype(jnp.float32))
    return wb.reshape(4, width * cin, 2 * width * cout).astype(dtype)


# ------------------------------ Pallas kernel ------------------------------ #

def _deconv_relu_kernel(x_ref, top_ref, bot_ref, w_ref, b_ref, o_ref):
    """One (sample, row-block) step of ConvTranspose2d(4,2,1) + bias + ReLU.

    x_ref  : (1, th, W*Cin)       main input rows of this block (lane-dense)
    top_ref: (1, hb, W*Cin)       contains input row  i*th - 1  (its last row)
    bot_ref: (1, hb, W*Cin)       contains input row (i+1)*th   (its first row)
    w_ref  : (4, W*Cin, 2W*Cout)  banded weights, one per (ph, dh) pair
    b_ref  : (1, 2W*Cout)         bias tiled over output columns (f32)
    o_ref  : (1, 2*th, 2W*Cout)   2*th output rows, flat NHWC, lane-dense
    """
    i = pl.program_id(1)
    n_rb = pl.num_programs(1)
    th = x_ref.shape[1]
    hb = top_ref.shape[1]
    out_cols = o_ref.shape[2]

    mid = x_ref[0]                                   # rows  m        (th, K)
    top = top_ref[0, hb - 1:hb, :]                   # row   i*th - 1 (1,  K)
    bot = bot_ref[0, 0:1, :]                         # row  (i+1)*th  (1,  K)

    # Fused zero halo above / below the image (scalar-broadcast multiply).
    top = top * (i > 0).astype(top.dtype)
    bot = bot * (i < n_rb - 1).astype(bot.dtype)

    up = jnp.concatenate([top, mid[:th - 1]], axis=0)    # rows m-1   (th, K)
    dn = jnp.concatenate([mid[1:], bot], axis=0)         # rows m+1   (th, K)

    f32 = jnp.float32
    acc0 = (jnp.dot(up,  w_ref[0], preferred_element_type=f32) +
            jnp.dot(mid, w_ref[1], preferred_element_type=f32))   # even rows
    acc1 = (jnp.dot(mid, w_ref[2], preferred_element_type=f32) +
            jnp.dot(dn,  w_ref[3], preferred_element_type=f32))   # odd rows

    bias = b_ref[...].astype(f32)                                 # (1, L)
    y0 = jnp.maximum(acc0 + bias, 0.0).astype(o_ref.dtype)
    y1 = jnp.maximum(acc1 + bias, 0.0).astype(o_ref.dtype)

    # Interleave even/odd output rows: (th, 2L) -> (1, 2*th, L); lane-dense store.
    y = jnp.concatenate([y0, y1], axis=-1).reshape(1, 2 * th, out_cols)
    o_ref[...] = y


# ------------------------- tiling / VMEM budgeting -------------------------- #

def _round_up(a, m):
    return -(-a // m) * m


def _vmem_capacity_bytes():
    try:
        return int(pltpu.get_tpu_info().vmem_capacity_bytes)
    except Exception:
        return 64 << 20      # conservative (v7x) default


def _vmem_estimate(th, width, cin, cout, abytes):
    """Rough per-step VMEM footprint (double-buffered blocks + temporaries),
    including (8,128) layout padding."""
    k_cols = _round_up(width * cin, 128)
    l_cols = _round_up(2 * width * cout, 128)
    rows = _round_up(th, 8)
    x_blk = 2 * rows * k_cols * abytes                       # main input block
    halo = 4 * 8 * k_cols * abytes                           # two halo blocks
    w_blk = 2 * 4 * _round_up(width * cin, 8) * l_cols * abytes
    o_blk = 2 * _round_up(2 * th, 8) * l_cols * abytes
    tmp = (2 * rows * k_cols * abytes                        # shifted row slabs
           + 2 * rows * l_cols * 4                           # f32 accumulators
           + rows * 2 * l_cols * abytes)                     # parity interleave
    return x_blk + halo + w_blk + o_blk + tmp


def _choose_row_block(height, width, cin, cout, abytes, budget):
    """Input rows per grid step: must divide H and be 8-aligned (or == H);
    pick the largest candidate fitting the per-generation VMEM budget."""
    cands = [d for d in range(1, height + 1)
             if height % d == 0 and (d == height or d % 8 == 0)]
    fits = [d for d in cands if _vmem_estimate(d, width, cin, cout, abytes) <= budget]
    if not fits:
        fits = [min(cands)]
    return max(fits)


# ------------------------------ layer wrapper ------------------------------- #

def _conv_transpose2d_relu_flat(x_flat, wbands, bias_row, *, height, width,
                                cin, cout, vmem_cap):
    """Exact ConvTranspose2d(4, 2, 1, bias=True) + ReLU on a flat-NHWC tensor.

    x_flat: (N, H, W*Cin)  ->  (N, 2H, 2W*Cout), same flat layout (lane-dense).
    """
    n = x_flat.shape[0]
    k_cols = width * cin
    l_cols = 2 * width * cout
    abytes = jnp.dtype(x_flat.dtype).itemsize

    th = _choose_row_block(height, width, cin, cout, abytes, int(vmem_cap * 0.5))
    n_rb = height // th
    hb = 8 if height % 8 == 0 else height           # halo block rows

    if n_rb > 1:                                     # th % 8 == 0 here
        tb = th // 8
        top_idx = lambda a, i: (a, jnp.maximum(i * tb - 1, 0), 0)
        bot_idx = lambda a, i: (a, jnp.minimum((i + 1) * tb, height // 8 - 1), 0)
    else:                                            # halo rows are masked anyway
        top_idx = lambda a, i: (a, 0, 0)
        bot_idx = lambda a, i: (a, 0, 0)

    est = _vmem_estimate(th, width, cin, cout, abytes)
    vmem_limit = int(min(vmem_cap - (8 << 20), max(32 << 20, 2 * est + (8 << 20))))

    return pl.pallas_call(
        _deconv_relu_kernel,
        out_shape=jax.ShapeDtypeStruct((n, 2 * height, l_cols), x_flat.dtype),
        grid=(n, n_rb),
        in_specs=[
            pl.BlockSpec((1, th, k_cols), lambda a, i: (a, i, 0)),      # main rows
            pl.BlockSpec((1, hb, k_cols), top_idx),                     # row above
            pl.BlockSpec((1, hb, k_cols), bot_idx),                     # row below
            pl.BlockSpec((4, k_cols, l_cols), lambda a, i: (0, 0, 0)),  # banded W
            pl.BlockSpec((1, l_cols), lambda a, i: (0, 0)),             # bias
        ],
        out_specs=pl.BlockSpec((1, 2 * th, l_cols), lambda a, i: (a, i, 0)),
        compiler_params=pltpu.CompilerParams(
            dimension_semantics=("parallel", "parallel"),
            vmem_limit_bytes=vmem_limit,
        ),
    )(x_flat, x_flat, x_flat, wbands, bias_row)


# ------------------------------ Decoder glue -------------------------------- #

def init_decoder_params(key, in_channel, num_filters):
    params = []
    c_in = in_channel
    for c_out in num_filters:
        key, k_w, k_b = jax.random.split(key, 3)
        w = 0.1 * jax.random.normal(k_w, (c_in, c_out, 4, 4), jnp.float32)
        b = 0.01 * jax.random.normal(k_b, (c_out,), jnp.float32)
        params.append((w, b))
        c_in = c_out
    return params


def prepare_decoder(params, in_channel, in_hw, compute_dtype=jnp.bfloat16):
    """Pre-bake per-layer banded weights / tiled biases (weights are static,
    so this is done once, outside the per-step forward)."""
    height, width = in_hw
    cin = in_channel
    layers = []
    for w, b in params:
        cout = w.shape[1]
        wb = _banded_weights(w, width, compute_dtype)
        bias = jnp.tile(jnp.asarray(b, jnp.float32), 2 * width).reshape(1, -1)
        layers.append(dict(wbands=wb, bias=bias, height=height, width=width,
                           cin=cin, cout=cout))
        cin = cout
        height, width = 2 * height, 2 * width
    return dict(layers=layers, compute_dtype=compute_dtype,
                out_channels=cin, out_hw=(height, width))


def decoder_forward(x_nchw, prepared):
    """Decoder.forward: sequential [ConvTranspose2d(4,2,1) + ReLU] blocks.
    Public API is NCHW (PyTorch); layers chain on a flat-NHWC layout internally."""
    n, c, h, w = x_nchw.shape
    dtype = prepared["compute_dtype"]
    vmem_cap = _vmem_capacity_bytes()
    x = jnp.transpose(x_nchw, (0, 2, 3, 1)).reshape(n, h, w * c).astype(dtype)
    for layer in prepared["layers"]:
        x = _conv_transpose2d_relu_flat(
            x, layer["wbands"], layer["bias"],
            height=layer["height"], width=layer["width"],
            cin=layer["cin"], cout=layer["cout"], vmem_cap=vmem_cap)
    h_out, w_out = prepared["out_hw"]
    c_out = prepared["out_channels"]
    x = x.reshape(n, h_out, w_out, c_out).astype(jnp.float32)
    return jnp.transpose(x, (0, 3, 1, 2))


def _reference_decoder(x_nchw, params):
    """Pure-XLA reference: ConvTranspose2d(4,2,1)+ReLU via lhs-dilated conv."""
    y = x_nchw
    for w, b in params:
        cout = w.shape[1]
        k = jnp.transpose(w, (1, 0, 2, 3))[:, :, ::-1, ::-1]   # (Cout,Cin,kh,kw) flipped
        y = lax.conv_general_dilated(
            y, k, window_strides=(1, 1), padding=((2, 2), (2, 2)),
            lhs_dilation=(2, 2), rhs_dilation=(1, 1),
            dimension_numbers=("NCHW", "OIHW", "NCHW"),
            precision=lax.Precision.HIGHEST)
        y = jnp.maximum(y + b.reshape(1, cout, 1, 1), 0.0)
    return y


# ------------------------------ demo ---------------------------------------- #

if __name__ == "__main__":
    key = jax.random.PRNGKey(0)
    in_channel = 4
    num_filters = (8, 4)
    n, h, w = 2, 16, 16

    kx, kp = jax.random.split(key)
    x = jax.random.normal(kx, (n, in_channel, h, w), jnp.float32)
    params = init_decoder_params(kp, in_channel, num_filters)

    ref = _reference_decoder(x, params)
    expected = (n, num_filters[-1],
                h * 2 ** len(num_filters), w * 2 ** len(num_filters))

    # f32 path: structural check of the banded-weight / halo / parity plumbing.
    prep_f32 = prepare_decoder(params, in_channel, (h, w),
                               compute_dtype=jnp.float32)
    out_f32 = jax.block_until_ready(
        jax.jit(lambda xin: decoder_forward(xin, prep_f32))(x))
    assert out_f32.shape == expected, (out_f32.shape, expected)
    assert bool(jnp.all(out_f32 >= 0.0))            # ReLU output is non-negative
    err32 = float(jnp.max(jnp.abs(out_f32 - ref)))
    assert bool(jnp.allclose(out_f32, ref, atol=1e-2, rtol=1e-2)), err32

    # bf16 path (default / fast): bf16 activations + weights, f32 MXU accumulate.
    prep_bf16 = prepare_decoder(params, in_channel, (h, w),
                                compute_dtype=jnp.bfloat16)
    out_bf16 = jax.block_until_ready(
        jax.jit(lambda xin: decoder_forward(xin, prep_bf16))(x))
    assert out_bf16.shape == expected
    err16 = float(jnp.max(jnp.abs(out_bf16 - ref)))
    assert bool(jnp.allclose(out_bf16, ref, atol=5e-2, rtol=5e-2)), err16

    print("KERNEL_OK")
</pallas_src>

<mosaic_0001>
module attributes {stable_mosaic.version = 11 : i64} {
  func.func @_deconv_relu_kernel(%arg0: i32, %arg1: i32, %arg2: memref<1x32x256xf32, #tpu.memory_space<vmem>>, %arg3: memref<1x8x256xf32, #tpu.memory_space<vmem>>, %arg4: memref<1x8x256xf32, #tpu.memory_space<vmem>>, %arg5: memref<4x256x256xf32, #tpu.memory_space<vmem>>, %arg6: memref<1x256xf32, #tpu.memory_space<vmem>>, %arg7: memref<1x64x256xf32, #tpu.memory_space<vmem>>) attributes {dimension_semantics = [#tpu.dimension_semantics<parallel>, #tpu.dimension_semantics<parallel>], iteration_bounds = array<i64: 2, 1>, scalar_prefetch = 0 : i64, scratch_operands = 0 : i64, tpu.core_type = #tpu.core_type<tc>, window_params = [{transform_indices = @transform_0, window_bounds = array<i64: 1, 32, 256>}, {transform_indices = @transform_1, window_bounds = array<i64: 1, 8, 256>}, {transform_indices = @transform_2, window_bounds = array<i64: 1, 8, 256>}, {pipeline_mode = #tpu.pipeline_mode<synchronous>, transform_indices = @transform_3, window_bounds = array<i64: 4, 256, 256>}, {pipeline_mode = #tpu.pipeline_mode<synchronous>, transform_indices = @transform_4, window_bounds = array<i64: 1, 256>}, {transform_indices = @transform_5, window_bounds = array<i64: 1, 64, 256>}]} {
    %c0 = arith.constant 0 : index
    %c0_0 = arith.constant 0 : index
    %c0_1 = arith.constant 0 : index
    %0 = vector.load %arg2[%c0, %c0_0, %c0_1] : memref<1x32x256xf32, #tpu.memory_space<vmem>>, vector<1x32x256xf32>
    %1 = vector.shape_cast %0 : vector<1x32x256xf32> to vector<32x256xf32>
    %c0_2 = arith.constant 0 : index
    %c7 = arith.constant 7 : index
    %c0_3 = arith.constant 0 : index
    %2 = vector.load %arg3[%c0_2, %c7, %c0_3] : memref<1x8x256xf32, #tpu.memory_space<vmem>>, vector<1x1x256xf32>
    %3 = vector.shape_cast %2 : vector<1x1x256xf32> to vector<1x256xf32>
    %c0_4 = arith.constant 0 : index
    %c0_5 = arith.constant 0 : index
    %c0_6 = arith.constant 0 : index
    %4 = vector.load %arg4[%c0_4, %c0_5, %c0_6] : memref<1x8x256xf32, #tpu.memory_space<vmem>>, vector<1x1x256xf32>
    %5 = vector.shape_cast %4 : vector<1x1x256xf32> to vector<1x256xf32>
    %c0_i32 = arith.constant 0 : i32
    %6 = arith.cmpi sgt, %arg1, %c0_i32 : i32
    %7 = arith.extui %6 : i1 to i32
    %8 = arith.sitofp %7 : i32 to f32
    %9 = vector.broadcast %8 : f32 to vector<1x256xf32>
    %10 = arith.mulf %3, %9 : vector<1x256xf32>
    %c0_i32_7 = arith.constant 0 : i32
    %11 = arith.cmpi slt, %arg1, %c0_i32_7 : i32
    %12 = arith.extui %11 : i1 to i32
    %13 = arith.sitofp %12 : i32 to f32
    %14 = vector.broadcast %13 : f32 to vector<1x256xf32>
    %15 = arith.mulf %5, %14 : vector<1x256xf32>
    %16 = vector.extract_strided_slice %1 {offsets = [0, 0], sizes = [31, 256], strides = [1, 1]} : vector<32x256xf32> to vector<31x256xf32>
    %17 = tpu.concatenate %10, %16 in 0 : vector<1x256xf32>, vector<31x256xf32> -> vector<32x256xf32>
    %18 = vector.extract_strided_slice %1 {offsets = [1, 0], sizes = [31, 256], strides = [1, 1]} : vector<32x256xf32> to vector<31x256xf32>
    %19 = tpu.concatenate %18, %15 in 0 : vector<31x256xf32>, vector<1x256xf32> -> vector<32x256xf32>
    %c0_8 = arith.constant 0 : index
    %c0_9 = arith.constant 0 : index
    %c0_10 = arith.constant 0 : index
    %20 = vector.load %arg5[%c0_8, %c0_9, %c0_10] : memref<4x256x256xf32, #tpu.memory_space<vmem>>, vector<1x256x256xf32>
    %21 = vector.shape_cast %20 : vector<1x256x256xf32> to vector<256x256xf32>
    %cst = arith.constant dense<0.000000e+00> : vector<32x256xf32>
    %22 = tpu.matmul %17, %21, %cst {dimension_numbers = #tpu.dot_dimension_numbers<[1], [0], [0], [1], [0, 0, 1, 1], [], []>} : vector<32x256xf32>, vector<256x256xf32>, vector<32x256xf32> -> vector<32x256xf32>
    %c1 = arith.constant 1 : index
    %c0_11 = arith.constant 0 : index
    %c0_12 = arith.constant 0 : index
    %23 = vector.load %arg5[%c1, %c0_11, %c0_12] : memref<4x256x256xf32, #tpu.memory_space<vmem>>, vector<1x256x256xf32>
    %24 = vector.shape_cast %23 : vector<1x256x256xf32> to vector<256x256xf32>
    %cst_13 = arith.constant dense<0.000000e+00> : vector<32x256xf32>
    %25 = tpu.matmul %1, %24, %cst_13 {dimension_numbers = #tpu.dot_dimension_numbers<[1], [0], [0], [1], [0, 0, 1, 1], [], []>} : vector<32x256xf32>, vector<256x256xf32>, vector<32x256xf32> -> vector<32x256xf32>
    %26 = arith.addf %22, %25 : vector<32x256xf32>
    %c2 = arith.constant 2 : index
    %c0_14 = arith.constant 0 : index
    %c0_15 = arith.constant 0 : index
    %27 = vector.load %arg5[%c2, %c0_14, %c0_15] : memref<4x256x256xf32, #tpu.memory_space<vmem>>, vector<1x256x256xf32>
    %28 = vector.shape_cast %27 : vector<1x256x256xf32> to vector<256x256xf32>
    %cst_16 = arith.constant dense<0.000000e+00> : vector<32x256xf32>
    %29 = tpu.matmul %1, %28, %cst_16 {dimension_numbers = #tpu.dot_dimension_numbers<[1], [0], [0], [1], [0, 0, 1, 1], [], []>} : vector<32x256xf32>, vector<256x256xf32>, vector<32x256xf32> -> vector<32x256xf32>
    %c3 = arith.constant 3 : index
    %c0_17 = arith.constant 0 : index
    %c0_18 = arith.constant 0 : index
    %30 = vector.load %arg5[%c3, %c0_17, %c0_18] : memref<4x256x256xf32, #tpu.memory_space<vmem>>, vector<1x256x256xf32>
    %31 = vector.shape_cast %30 : vector<1x256x256xf32> to vector<256x256xf32>
    %cst_19 = arith.constant dense<0.000000e+00> : vector<32x256xf32>
    %32 = tpu.matmul %19, %31, %cst_19 {dimension_numbers = #tpu.dot_dimension_numbers<[1], [0], [0], [1], [0, 0, 1, 1], [], []>} : vector<32x256xf32>, vector<256x256xf32>, vector<32x256xf32> -> vector<32x256xf32>
    %33 = arith.addf %29, %32 : vector<32x256xf32>
    %c0_20 = arith.constant 0 : index
    %c0_21 = arith.constant 0 : index
    %34 = vector.load %arg6[%c0_20, %c0_21] : memref<1x256xf32, #tpu.memory_space<vmem>>, vector<1x256xf32>
    %35 = vector.broadcast %34 : vector<1x256xf32> to vector<32x256xf32>
    %36 = arith.addf %26, %35 : vector<32x256xf32>
    %cst_22 = arith.constant 0.000000e+00 : f32
    %37 = vector.broadcast %cst_22 : f32 to vector<32x256xf32>
    %38 = arith.maximumf %36, %37 : vector<32x256xf32>
    %39 = vector.broadcast %34 : vector<1x256xf32> to vector<32x256xf32>
    %40 = arith.addf %33, %39 : vector<32x256xf32>
    %cst_23 = arith.constant 0.000000e+00 : f32
    %41 = vector.broadcast %cst_23 : f32 to vector<32x256xf32>
    %42 = arith.maximumf %40, %41 : vector<32x256xf32>
    %43 = tpu.concatenate %38, %42 in 1 : vector<32x256xf32>, vector<32x256xf32> -> vector<32x512xf32>
    %44 = vector.shape_cast %43 : vector<32x512xf32> to vector<1x64x256xf32>
    %c0_24 = arith.constant 0 : index
    %c0_25 = arith.constant 0 : index
    %c0_26 = arith.constant 0 : index
    %45 = vector.load %arg7[%c0_24, %c0_25, %c0_26] : memref<1x64x256xf32, #tpu.memory_space<vmem>>, vector<1x64x256xf32>
    tpu.vector_store %arg7[%c0_24, %c0_25, %c0_26], %44 {strides = array<i32>} : memref<1x64x256xf32, #tpu.memory_space<vmem>>, vector<1x64x256xf32>,
    return
  }
  func.func @transform_0(%arg0: i32, %arg1: i32) -> (i32, i32, i32) {
    %c0_i32 = arith.constant 0 : i32
    %c0_i32_0 = arith.constant 0 : i32
    return %arg0, %arg1, %c0_i32 : i32, i32, i32
  }
  func.func @transform_1(%arg0: i32, %arg1: i32) -> (i32, i32, i32) {
    %c0_i32 = arith.constant 0 : i32
    %c0_i32_0 = arith.constant 0 : i32
    %c0_i32_1 = arith.constant 0 : i32
    return %arg0, %c0_i32, %c0_i32_0 : i32, i32, i32
  }
  func.func @transform_2(%arg0: i32, %arg1: i32) -> (i32, i32, i32) {
    %c0_i32 = arith.constant 0 : i32
    %c0_i32_0 = arith.constant 0 : i32
    %c0_i32_1 = arith.constant 0 : i32
    return %arg0, %c0_i32, %c0_i32_0 : i32, i32, i32
  }
  func.func @transform_3(%arg0: i32, %arg1: i32) -> (i32, i32, i32) {
    %c0_i32 = arith.constant 0 : i32
    %c0_i32_0 = arith.constant 0 : i32
    %c0_i32_1 = arith.constant 0 : i32
    %c0_i32_2 = arith.constant 0 : i32
    return %c0_i32, %c0_i32_0, %c0_i32_1 : i32, i32, i32
  }
  func.func @transform_4(%arg0: i32, %arg1: i32) -> (i32, i32) {
    %c0_i32 = arith.constant 0 : i32
    %c0_i32_0 = arith.constant 0 : i32
    %c0_i32_1 = arith.constant 0 : i32
    return %c0_i32, %c0_i32_0 : i32, i32
  }
  func.func @transform_5(%arg0: i32, %arg1: i32) -> (i32, i32, i32) {
    %c0_i32 = arith.constant 0 : i32
    %c0_i32_0 = arith.constant 0 : i32
    return %arg0, %arg1, %c0_i32 : i32, i32, i32
  }
}

module attributes {stable_mosaic.version = 11 : i64} {
  func.func @_deconv_relu_kernel(%arg0: i32, %arg1: i32, %arg2: memref<1x16x64xf32, #tpu.memory_space<vmem>>, %arg3: memref<1x8x64xf32, #tpu.memory_space<vmem>>, %arg4: memref<1x8x64xf32, #tpu.memory_space<vmem>>, %arg5: memref<4x64x256xf32, #tpu.memory_space<vmem>>, %arg6: memref<1x256xf32, #tpu.memory_space<vmem>>, %arg7: memref<1x32x256xf32, #tpu.memory_space<vmem>>) attributes {dimension_semantics = [#tpu.dimension_semantics<parallel>, #tpu.dimension_semantics<parallel>], iteration_bounds = array<i64: 2, 1>, scalar_prefetch = 0 : i64, scratch_operands = 0 : i64, tpu.core_type = #tpu.core_type<tc>, window_params = [{transform_indices = @transform_0, window_bounds = array<i64: 1, 16, 64>}, {transform_indices = @transform_1, window_bounds = array<i64: 1, 8, 64>}, {transform_indices = @transform_2, window_bounds = array<i64: 1, 8, 64>}, {pipeline_mode = #tpu.pipeline_mode<synchronous>, transform_indices = @transform_3, window_bounds = array<i64: 4, 64, 256>}, {pipeline_mode = #tpu.pipeline_mode<synchronous>, transform_indices = @transform_4, window_bounds = array<i64: 1, 256>}, {transform_indices = @transform_5, window_bounds = array<i64: 1, 32, 256>}]} {
    %c0 = arith.constant 0 : index
    %c0_0 = arith.constant 0 : index
    %c0_1 = arith.constant 0 : index
    %0 = vector.load %arg2[%c0, %c0_0, %c0_1] : memref<1x16x64xf32, #tpu.memory_space<vmem>>, vector<1x16x64xf32>
    %1 = vector.shape_cast %0 : vector<1x16x64xf32> to vector<16x64xf32>
    %c0_2 = arith.constant 0 : index
    %c7 = arith.constant 7 : index
    %c0_3 = arith.constant 0 : index
    %2 = vector.load %arg3[%c0_2, %c7, %c0_3] : memref<1x8x64xf32, #tpu.memory_space<vmem>>, vector<1x1x64xf32>
    %3 = vector.shape_cast %2 : vector<1x1x64xf32> to vector<1x64xf32>
    %c0_4 = arith.constant 0 : index
    %c0_5 = arith.constant 0 : index
    %c0_6 = arith.constant 0 : index
    %4 = vector.load %arg4[%c0_4, %c0_5, %c0_6] : memref<1x8x64xf32, #tpu.memory_space<vmem>>, vector<1x1x64xf32>
    %5 = vector.shape_cast %4 : vector<1x1x64xf32> to vector<1x64xf32>
    %c0_i32 = arith.constant 0 : i32
    %6 = arith.cmpi sgt, %arg1, %c0_i32 : i32
    %7 = arith.extui %6 : i1 to i32
    %8 = arith.sitofp %7 : i32 to f32
    %9 = vector.broadcast %8 : f32 to vector<1x64xf32>
    %10 = arith.mulf %3, %9 : vector<1x64xf32>
    %c0_i32_7 = arith.constant 0 : i32
    %11 = arith.cmpi slt, %arg1, %c0_i32_7 : i32
    %12 = arith.extui %11 : i1 to i32
    %13 = arith.sitofp %12 : i32 to f32
    %14 = vector.broadcast %13 : f32 to vector<1x64xf32>
    %15 = arith.mulf %5, %14 : vector<1x64xf32>
    %16 = vector.extract_strided_slice %1 {offsets = [0, 0], sizes = [15, 64], strides = [1, 1]} : vector<16x64xf32> to vector<15x64xf32>
    %17 = tpu.concatenate %10, %16 in 0 : vector<1x64xf32>, vector<15x64xf32> -> vector<16x64xf32>
    %18 = vector.extract_strided_slice %1 {offsets = [1, 0], sizes = [15, 64], strides = [1, 1]} : vector<16x64xf32> to vector<15x64xf32>
    %19 = tpu.concatenate %18, %15 in 0 : vector<15x64xf32>, vector<1x64xf32> -> vector<16x64xf32>
    %c0_8 = arith.constant 0 : index
    %c0_9 = arith.constant 0 : index
    %c0_10 = arith.constant 0 : index
    %20 = vector.load %arg5[%c0_8, %c0_9, %c0_10] : memref<4x64x256xf32, #tpu.memory_space<vmem>>, vector<1x64x256xf32>
    %21 = vector.shape_cast %20 : vector<1x64x256xf32> to vector<64x256xf32>
    %cst = arith.constant dense<0.000000e+00> : vector<16x256xf32>
    %22 = tpu.matmul %17, %21, %cst {dimension_numbers = #tpu.dot_dimension_numbers<[1], [0], [0], [1], [0, 0, 1, 1], [], []>} : vector<16x64xf32>, vector<64x256xf32>, vector<16x256xf32> -> vector<16x256xf32>
    %c1 = arith.constant 1 : index
    %c0_11 = arith.constant 0 : index
    %c0_12 = arith.constant 0 : index
    %23 = vector.load %arg5[%c1, %c0_11, %c0_12] : memref<4x64x256xf32, #tpu.memory_space<vmem>>, vector<1x64x256xf32>
    %24 = vector.shape_cast %23 : vector<1x64x256xf32> to vector<64x256xf32>
    %cst_13 = arith.constant dense<0.000000e+00> : vector<16x256xf32>
    %25 = tpu.matmul %1, %24, %cst_13 {dimension_numbers = #tpu.dot_dimension_numbers<[1], [0], [0], [1], [0, 0, 1, 1], [], []>} : vector<16x64xf32>, vector<64x256xf32>, vector<16x256xf32> -> vector<16x256xf32>
    %26 = arith.addf %22, %25 : vector<16x256xf32>
    %c2 = arith.constant 2 : index
    %c0_14 = arith.constant 0 : index
    %c0_15 = arith.constant 0 : index
    %27 = vector.load %arg5[%c2, %c0_14, %c0_15] : memref<4x64x256xf32, #tpu.memory_space<vmem>>, vector<1x64x256xf32>
    %28 = vector.shape_cast %27 : vector<1x64x256xf32> to vector<64x256xf32>
    %cst_16 = arith.constant dense<0.000000e+00> : vector<16x256xf32>
    %29 = tpu.matmul %1, %28, %cst_16 {dimension_numbers = #tpu.dot_dimension_numbers<[1], [0], [0], [1], [0, 0, 1, 1], [], []>} : vector<16x64xf32>, vector<64x256xf32>, vector<16x256xf32> -> vector<16x256xf32>
    %c3 = arith.constant 3 : index
    %c0_17 = arith.constant 0 : index
    %c0_18 = arith.constant 0 : index
    %30 = vector.load %arg5[%c3, %c0_17, %c0_18] : memref<4x64x256xf32, #tpu.memory_space<vmem>>, vector<1x64x256xf32>
    %31 = vector.shape_cast %30 : vector<1x64x256xf32> to vector<64x256xf32>
    %cst_19 = arith.constant dense<0.000000e+00> : vector<16x256xf32>
    %32 = tpu.matmul %19, %31, %cst_19 {dimension_numbers = #tpu.dot_dimension_numbers<[1], [0], [0], [1], [0, 0, 1, 1], [], []>} : vector<16x64xf32>, vector<64x256xf32>, vector<16x256xf32> -> vector<16x256xf32>
    %33 = arith.addf %29, %32 : vector<16x256xf32>
    %c0_20 = arith.constant 0 : index
    %c0_21 = arith.constant 0 : index
    %34 = vector.load %arg6[%c0_20, %c0_21] : memref<1x256xf32, #tpu.memory_space<vmem>>, vector<1x256xf32>
    %35 = vector.broadcast %34 : vector<1x256xf32> to vector<16x256xf32>
    %36 = arith.addf %26, %35 : vector<16x256xf32>
    %cst_22 = arith.constant 0.000000e+00 : f32
    %37 = vector.broadcast %cst_22 : f32 to vector<16x256xf32>
    %38 = arith.maximumf %36, %37 : vector<16x256xf32>
    %39 = vector.broadcast %34 : vector<1x256xf32> to vector<16x256xf32>
    %40 = arith.addf %33, %39 : vector<16x256xf32>
    %cst_23 = arith.constant 0.000000e+00 : f32
    %41 = vector.broadcast %cst_23 : f32 to vector<16x256xf32>
    %42 = arith.maximumf %40, %41 : vector<16x256xf32>
    %43 = tpu.concatenate %38, %42 in 1 : vector<16x256xf32>, vector<16x256xf32> -> vector<16x512xf32>
    %44 = vector.shape_cast %43 : vector<16x512xf32> to vector<1x32x256xf32>
    %c0_24 = arith.constant 0 : index
    %c0_25 = arith.constant 0 : index
    %c0_26 = arith.constant 0 : index
    %45 = vector.load %arg7[%c0_24, %c0_25, %c0_26] : memref<1x32x256xf32, #tpu.memory_space<vmem>>, vector<1x32x256xf32>
    tpu.vector_store %arg7[%c0_24, %c0_25, %c0_26], %44 {strides = array<i32>} : memref<1x32x256xf32, #tpu.memory_space<vmem>>, vector<1x32x256xf32>,
    return
  }
  func.func @transform_0(%arg0: i32, %arg1: i32) -> (i32, i32, i32) {
    %c0_i32 = arith.constant 0 : i32
    %c0_i32_0 = arith.constant 0 : i32
    return %arg0, %arg1, %c0_i32 : i32, i32, i32
  }
  func.func @transform_1(%arg0: i32, %arg1: i32) -> (i32, i32, i32) {
    %c0_i32 = arith.constant 0 : i32
    %c0_i32_0 = arith.constant 0 : i32
    %c0_i32_1 = arith.constant 0 : i32
    return %arg0, %c0_i32, %c0_i32_0 : i32, i32, i32
  }
  func.func @transform_2(%arg0: i32, %arg1: i32) -> (i32, i32, i32) {
    %c0_i32 = arith.constant 0 : i32
    %c0_i32_0 = arith.constant 0 : i32
    %c0_i32_1 = arith.constant 0 : i32
    return %arg0, %c0_i32, %c0_i32_0 : i32, i32, i32
  }
  func.func @transform_3(%arg0: i32, %arg1: i32) -> (i32, i32, i32) {
    %c0_i32 = arith.constant 0 : i32
    %c0_i32_0 = arith.constant 0 : i32
    %c0_i32_1 = arith.constant 0 : i32
    %c0_i32_2 = arith.constant 0 : i32
    return %c0_i32, %c0_i32_0, %c0_i32_1 : i32, i32, i32
  }
  func.func @transform_4(%arg0: i32, %arg1: i32) -> (i32, i32) {
    %c0_i32 = arith.constant 0 : i32
    %c0_i32_0 = arith.constant 0 : i32
    %c0_i32_1 = arith.constant 0 : i32
    return %c0_i32, %c0_i32_0 : i32, i32
  }
  func.func @transform_5(%arg0: i32, %arg1: i32) -> (i32, i32, i32) {
    %c0_i32 = arith.constant 0 : i32
    %c0_i32_0 = arith.constant 0 : i32
    return %arg0, %arg1, %c0_i32 : i32, i32, i32
  }
}

</mosaic_0001>

<bundles_post_ra>
// kernel: _lambda_.2
= control target key start
LH: loop header
LB: loop body
LE: loop exit
PB: predicated region body
PF: predicated region fallthrough
CT: control target
= control target key end

     0   :  { %10 = vsyncpa [#allocation3], 0  ;;  %s1075_s18 = smov 0   ;;  %s1077_s19 = smov 0   ;;  %s1214_s0 = inlined_call_operand.vmem [shape: f32[2,16,64], index: 0, kind: input, shape index: {}, may-alias: {0,1,2}]   ;;  %s1215_s1 = inlined_call_operand.vmem [shape: f32[2,16,64], index: 1, kind: input, shape index: {}, may-alias: {0,1,2}]   ;;  %s1216_s2 = inlined_call_operand.vmem [shape: f32[2,16,64], index: 2, kind: input, shape index: {}, may-alias: {0,1,2}]   ;;  %s1217_s3 = inlined_call_operand.hbm [shape: f32[4,64,256], index: 3, kind: input, shape index: {}]   ;;  %s1218_s4 = inlined_call_operand.vmem [shape: f32[1,256], index: 4, kind: input, shape index: {}]   ;;  %s1219_s5 = inlined_call_operand.vmem [shape: f32[2,32,256], index: 5, kind: output, shape index: {}]  }
   0x1   :  { %s1079_s20 = smov 0  }
   0x2 LB: > { %s908_s21 = sadd.s32 4294967295, %s1039_s20   ;;  %s28_s22 = sadd.s32 1, %s1035_s19  ;;  %s1039_s20 = sphi %s1079_s20, %s16_s20   ;;  %s1035_s19 = sphi %s1077_s19, %s1221_s19   ;;  %s1031_s18 = sphi %s1075_s18, %s1220_s18  }
   0x3   : > { %p30_p0 = scmp.ge.s32.totalorder %s28_s22, 2  ;;  %p910_p1 = scmp.ge.s32.totalorder %s1039_s20, 1 }
   0x4   : > { %p183_p2 = scmp.lt.s32.totalorder %s1039_s20, 3  ;;  %p953_p4 = scmp.eq.s32.totalorder %s908_s21, 0 }
   0x5   : > { %s1223_s22 = smov (%p30_p0, %s28_s22), 0  ;;  %s194_s25 = sshll.u32 %s1217_s3, 4  ;;  %s195_s25 = int_to_ptr.hbm [resolvable:$true] %s194_s25 }
   0x6   : > { %p184_p3 = pnand %p910_p1, %p183_p2  ;;  %s1041_s26 = smov [#allocation2]  }
   0x7   : > { %s196_s27 = sshll.u32 %s1041_s26, 4  ;;  %s1042_s28 = smov 256   ;;  %s197_s27 = int_to_ptr.vmem [resolvable:$true] %s196_s27 }
   0x8   : > { %p949_p5 = pneg %p184_p3  ;;  %s1043_s29 = smov 16  }
   0x9   : > { %244 = sbr.rel (%p184_p3) target bundleno = 224 (0xe0), region = 40 }
   0xa   : > { %p950_p6 = pnand %p953_p4, %p949_p5 }
   0xc   : > { %952 = dma.hbm_to_vmem [thread:$0]  (!%p950_p6), %s195_s25, 8192, %s197_s27, [#allocation3], %s1042_s28, %s1042_s28, %s1043_s29  }
   0xe   : > { %1026 = dma.done.wait (%p953_p4), [#allocation3], 8192  }
   0xf   : > { %1028 = vsyncadd (%p953_p4), [#allocation3], 4294959104  ;;  %p293_p7 = scmp.lt.s32.totalorder %s1031_s18, 1  ;;  %v368_v0 = vld [vmem:[#allocation2 + $0x70] sm:$0xff]  ;;  %v369_v1 = vld [vmem:[#allocation2 + $0x78] sm:$0xff]  ;;  %vm339_vm0 = vcmask 1040384  }
  0x10   : > { %v366_v2 = vld [vmem:[#allocation2 + $0x60] sm:$0xff]  ;;  %451 = vmatpush.msra.mxu2 %v368_v0  ;;  %474 = vmatpush.msra.mxu3 %v369_v1  ;;  %v367_v3 = vld [vmem:[#allocation2 + $0x68] sm:$0xff]  ;;  %v364_v4 = vld [vmem:[#allocation2 + $0x50] sm:$0xff]  ;;  %vm387_vm1 = vcmask 523264   ;;  %vm345_vm2 = vcmask 1046528   ;;  %vm656_vm3 = vcmask 1041408  }
  0x11   : > { %s1225_s18 = smov (!%p293_p7, %s1031_s18), 1  ;;  %v365_v5 = vld [vmem:[#allocation2 + $0x58] sm:$0xff]  ;;  %v385_v6 = vld [vmem:[#allocation2 + $0xf0] sm:$0xff]  ;;  %v383_v8 = vld [vmem:[#allocation2 + $0xe0] sm:$0xff]  ;;  %vm658_vm4 = vcmask 1045508   ;;  %vm662_vm5 = vcmask 1043458  }
  0x12   : > { %v386_v7 = vld [vmem:[#allocation2 + $0xf8] sm:$0xff]  ;;  %s1100_s30 = sshll.u32 %s1225_s18, 4  ;;  %452 = vmatpush.msra.mxu2 %v366_v2  ;;  %475 = vmatpush.msra.mxu3 %v367_v3  ;;  %v384_v9 = vld [vmem:[#allocation2 + $0xe8] sm:$0xff]  ;;  %v362_v10 = vld [vmem:[#allocation2 + $0x40] sm:$0xff]  ;;  %vm664_vm6 = vcmask 1045504   ;;  %vm660_vm7 = vcmask 1043456  }
  0x13   : > { %400 = vmatpush.msra.mxu0 %v385_v6  ;;  %423 = vmatpush.msra.mxu1 %v386_v7  ;;  %v363_v11 = vld [vmem:[#allocation2 + $0x48] sm:$0xff]  ;;  %v381_v12 = vld [vmem:[#allocation2 + $0xd0] sm:$0xff]  ;;  %v382_v13 = vld [vmem:[#allocation2 + $0xd8] sm:$0xff]  ;;  %s1106_s8 = scalar_lea.vmem %s1214_s0, %s1100_s30  ;;  %s306_s11 = scalar_lea.vmem %s1215_s1, %s1100_s30  ;;  %vm666_vm8 = vcmask 1045506  }
  0x14   : > { %453 = vmatpush.msra.mxu2 %v364_v4  ;;  %476 = vmatpush.msra.mxu3 %v365_v5  ;;  %v360_v14 = vld [vmem:[#allocation2 + $0x30] sm:$0xff]  ;;  %v361_v15 = vld [vmem:[#allocation2 + $0x38] sm:$0xff]  ;;  %v379_v16 = vld [vmem:[#allocation2 + $0xc0] sm:$0xff]  ;;  %s311_s14 = scalar_lea.vmem %s1216_s2, %s1100_s30  ;;  %s944_s17 = sshll.u32 %s1225_s18, 6 }
  0x15   : > { %401 = vmatpush.msra.mxu0 %v383_v8  ;;  %424 = vmatpush.msra.mxu1 %v384_v9  ;;  %v380_v17 = vld [vmem:[#allocation2 + $0xc8] sm:$0xff]  ;;  %v358_v18 = vld [vmem:[#allocation2 + $0x20] sm:$0xff]  ;;  %v1113_v20 = vld [vmem:[%s1106_s8] sm:$0xff]  ;;  %s1183_s24 = scalar_lea.vmem %s1219_s5, %s944_s17 }
  0x16   : > { %454 = vmatpush.msra.mxu2 %v362_v10  ;;  %477 = vmatpush.msra.mxu3 %v363_v11  ;;  %v359_v19 = vld [vmem:[#allocation2 + $0x28] sm:$0xff]  ;;  %v377_v21 = vld [vmem:[#allocation2 + $0xb0] sm:$0xff]  ;;  %v378_v22 = vld [vmem:[#allocation2 + $0xb8] sm:$0xff]  ;;  %v340_v24 = vrot.slane %v1113_v20, 7  ;;  %v346_v4 = vrot.slane %v1113_v20, 1 }
  0x17   : > { %402 = vmatpush.msra.mxu0 %v381_v12  ;;  %425 = vmatpush.msra.mxu1 %v382_v13  ;;  %v325_v23 = vld [vmem:[%s306_s11 + $0x7] sm:$0x1]  ;;  %v356_v25 = vld [vmem:[#allocation2 + $0x10] sm:$0xff]  ;;  %v375_v28 = vld [vmem:[#allocation2 + $0xa0] sm:$0xff] }
  0x18   : > { %455 = vmatpush.msra.mxu2 %v360_v14  ;;  %478 = vmatpush.msra.mxu3 %v361_v15  ;;  %v357_v26 = vld [vmem:[#allocation2 + $0x18] sm:$0xff]  ;;  %v331_v27 = vmul.f32 0.0, %v325_v23  ;;  %v376_v29 = vld [vmem:[#allocation2 + $0xa8] sm:$0xff]  ;;  %v354_v30 = vld [vmem:[#allocation2] sm:$0xff] }
  0x19   : > { %403 = vmatpush.msra.mxu0 %v379_v16  ;;  %426 = vmatpush.msra.mxu1 %v380_v17  ;;  %v355_v31 = vld [vmem:[#allocation2 + $0x8] sm:$0xff]  ;;  %v504_v33 = vld [vmem:[#allocation2 + $0x170] sm:$0xff]  ;;  %v505_v34 = vld [vmem:[#allocation2 + $0x178] sm:$0xff] }
  0x1a   : > { %456 = vmatpush.msra.mxu2 %v358_v18  ;;  %479 = vmatpush.msra.mxu3 %v359_v19  ;;  %v344_v32 = vsel %vm339_vm0, %v331_v27, %v340_v24  ;;  %v1118_v35 = vld [vmem:[%s1106_s8 + $0x8] sm:$0xff]  ;;  %v373_v36 = vld [vmem:[#allocation2 + $0x90] sm:$0xff]  ;;  %v374_v37 = vld [vmem:[#allocation2 + $0x98] sm:$0xff] }
  0x1b   : > { %404 = vmatpush.msra.mxu0 %v377_v21  ;;  %427 = vmatpush.msra.mxu1 %v378_v22  ;;  %v502_v38 = vld [vmem:[#allocation2 + $0x160] sm:$0xff]  ;;  %v503_v39 = vld [vmem:[#allocation2 + $0x168] sm:$0xff]  ;;  %v500_v42 = vld [vmem:[#allocation2 + $0x150] sm:$0xff]  ;;  %v341_v44 = vrot.slane %v1118_v35, 7  ;;  %v347_v5 = vrot.slane %v1118_v35, 1 }
  0x1c   : > { %457 = vmatpush.msra.mxu2 %v356_v25  ;;  %480 = vmatpush.msra.mxu3 %v357_v26  ;;  %v371_v40 = vld [vmem:[#allocation2 + $0x80] sm:$0xff]  ;;  %v372_v41 = vld [vmem:[#allocation2 + $0x88] sm:$0xff]  ;;  %v501_v43 = vld [vmem:[#allocation2 + $0x158] sm:$0xff] }
  0x1d   : > { %405 = vmatpush.msra.mxu0 %v375_v28  ;;  %428 = vmatpush.msra.mxu1 %v376_v29  ;;  %v521_v45 = vld [vmem:[#allocation2 + $0x1f0] sm:$0xff]  ;;  %v522_v46 = vld [vmem:[#allocation2 + $0x1f8] sm:$0xff]  ;;  %v498_v47 = vld [vmem:[#allocation2 + $0x140] sm:$0xff]  ;;  %v342_v49 = vsel %vm339_vm0, %v340_v24, %v341_v44  ;;  %v348_v11 = vsel %vm345_vm2, %v346_v4, %v347_v5 }
  0x1e   : > { %458 = vmatpush.msra.mxu2 %v354_v30  ;;  %481 = vmatpush.msra.mxu3 %v355_v31  ;;  %v499_v48 = vld [vmem:[#allocation2 + $0x148] sm:$0xff]  ;;  %v519_v50 = vld [vmem:[#allocation2 + $0x1e0] sm:$0xff]  ;;  %v496_v52 = vld [vmem:[#allocation2 + $0x130] sm:$0xff] }
  0x1f   : > { %927 = vmatmul.msk.f32.vlgmr.msra.gmra.mxu2 %vm387_vm1, %v344_v32  ;;  %929 = vmatmul.msk.f32.vlgmr.msra.gmra.mxu3 %vm387_vm1, %v344_v32  ;;  %v520_v51 = vld [vmem:[#allocation2 + $0x1e8] sm:$0xff]  ;;  %v497_v53 = vld [vmem:[#allocation2 + $0x138] sm:$0xff]  ;;  %v517_v54 = vld [vmem:[#allocation2 + $0x1d0] sm:$0xff] }
  0x20   : > { %582 = vmatpush.msrb.mxu2 %v504_v33  ;;  %605 = vmatpush.msrb.mxu3 %v505_v34  ;;  %v518_v55 = vld [vmem:[#allocation2 + $0x1d8] sm:$0xff]  ;;  %v494_v56 = vld [vmem:[#allocation2 + $0x120] sm:$0xff]  ;;  %v495_v57 = vld [vmem:[#allocation2 + $0x128] sm:$0xff] }
  0x21   : > { %406 = vmatpush.msra.mxu0 %v373_v36  ;;  %429 = vmatpush.msra.mxu1 %v374_v37  ;;  %v515_v58 = vld [vmem:[#allocation2 + $0x1c0] sm:$0xff]  ;;  %v516_v59 = vld [vmem:[#allocation2 + $0x1c8] sm:$0xff]  ;;  %v492_v60 = vld [vmem:[#allocation2 + $0x110] sm:$0xff] }
  0x22   : > { %583 = vmatpush.msrb.mxu2 %v502_v38  ;;  %606 = vmatpush.msrb.mxu3 %v503_v39  ;;  %v493_v61 = vld [vmem:[#allocation2 + $0x118] sm:$0xff]  ;;  %v513_v62 = vld [vmem:[#allocation2 + $0x1b0] sm:$0xff]  ;;  %v490_v0 = vld [vmem:[#allocation2 + $0x100] sm:$0xff]  ;;  %v1044_v38 = vmov 1935823168  }
  0x23   : > { %407 = vmatpush.msra.mxu0 %v371_v40  ;;  %430 = vmatpush.msra.mxu1 %v372_v41  ;;  %v514_v63 = vld [vmem:[#allocation2 + $0x1b8] sm:$0xff]  ;;  %v491_v1 = vld [vmem:[#allocation2 + $0x108] sm:$0xff]  ;;  %v511_v2 = vld [vmem:[#allocation2 + $0x1a0] sm:$0xff]  ;;  %v701_v39 = vunpack.c.l.s4 %v1044_v38 }
  0x24   : > { %584 = vmatpush.msrb.mxu2 %v500_v42  ;;  %607 = vmatpush.msrb.mxu3 %v501_v43  ;;  %v512_v3 = vld [vmem:[#allocation2 + $0x1a8] sm:$0xff]  ;;  %v509_v6 = vld [vmem:[#allocation2 + $0x190] sm:$0xff]  ;;  %v510_v7 = vld [vmem:[#allocation2 + $0x198] sm:$0xff] }
  0x25   : > { %923 = vmatmul.msk.f32.vlgmr.msra.gmra.mxu0 %vm387_vm1, %v1113_v20  ;;  %925 = vmatmul.msk.f32.vlgmr.msra.gmra.mxu1 %vm387_vm1, %v1113_v20  ;;  %v326_v8 = vld [vmem:[%s311_s14] sm:$0x1]  ;;  %v507_v9 = vld [vmem:[#allocation2 + $0x180] sm:$0xff]  ;;  %v508_v10 = vld [vmem:[#allocation2 + $0x188] sm:$0xff] }
  0x26   : > { %536 = vmatpush.msrb.mxu0 %v521_v45  ;;  %559 = vmatpush.msrb.mxu1 %v522_v46  ;;  %v336_v12 = vmul.f32 0.0, %v326_v8  ;;  %v620_v19 = vld [vmem:[%s1218_s4] sm:$0x3] }
  0x27   : > { %585 = vmatpush.msrb.mxu2 %v498_v47  ;;  %608 = vmatpush.msrb.mxu3 %v499_v48  ;;  %v623_v25 = vperm.slane %v620_v19, 1  ;;  %v622_v28 = vperm.slane %v620_v19, 0  ;;  %v1157_v47 = vunpack.c.0.s8 %v701_v39 }
  0x28   : > { %928 = vmatmul.msk.f32.gmra.mxu2 %vm387_vm1, %v342_v49  ;;  %930 = vmatmul.msk.f32.gmra.mxu3 %vm387_vm1, %v342_v49  ;;  %v351_v13 = vrot.slane %v336_v12, 1 }
  0x29   : > { %537 = vmatpush.msrb.mxu0 %v519_v50  ;;  %560 = vmatpush.msrb.mxu1 %v520_v51 }
  0x2a   : > { %586 = vmatpush.msrb.mxu2 %v496_v52  ;;  %609 = vmatpush.msrb.mxu3 %v497_v53  ;;  %v353_v14 = vsel %vm345_vm2, %v347_v5, %v351_v13 }
  0x2b   : > { %538 = vmatpush.msrb.mxu0 %v517_v54  ;;  %561 = vmatpush.msrb.mxu1 %v518_v55 }
  0x2c   : > { %587 = vmatpush.msrb.mxu2 %v494_v56  ;;  %610 = vmatpush.msrb.mxu3 %v495_v57 }
  0x2d   : > { %539 = vmatpush.msrb.mxu0 %v515_v58  ;;  %562 = vmatpush.msrb.mxu1 %v516_v59 }
  0x2e   : > { %588 = vmatpush.msrb.mxu2 %v492_v60  ;;  %611 = vmatpush.msrb.mxu3 %v493_v61 }
  0x2f   : > { %924 = vmatmul.msk.f32.gmra.mxu0 %vm387_vm1, %v1118_v35  ;;  %926 = vmatmul.msk.f32.gmra.mxu1 %vm387_vm1, %v1118_v35 }
  0x30   : > { %540 = vmatpush.msrb.mxu0 %v513_v62  ;;  %563 = vmatpush.msrb.mxu1 %v514_v63 }
  0x31   : > { %589 = vmatpush.msrb.mxu2 %v490_v0  ;;  %612 = vmatpush.msrb.mxu3 %v491_v1 }
  0x32   : > { %541 = vmatpush.msrb.mxu0 %v511_v2  ;;  %564 = vmatpush.msrb.mxu1 %v512_v3 }
  0x33   : > { %935 = vmatmul.msk.f32.vlgmr.msrb.gmra.mxu2 %vm387_vm1, %v1113_v20  ;;  %937 = vmatmul.msk.f32.vlgmr.msrb.gmra.mxu3 %vm387_vm1, %v1113_v20 }
  0x34   : > { %542 = vmatpush.msrb.mxu0 %v509_v6  ;;  %565 = vmatpush.msrb.mxu1 %v510_v7 }
  0x36   : > { %543 = vmatpush.msrb.mxu0 %v507_v9  ;;  %566 = vmatpush.msrb.mxu1 %v508_v10 }
  0x37   : > { %931 = vmatmul.msk.f32.vlgmr.msrb.gmra.mxu0 %vm387_vm1, %v348_v11  ;;  %933 = vmatmul.msk.f32.vlgmr.msrb.gmra.mxu1 %vm387_vm1, %v348_v11 }
  0x3b   : > { %936 = vmatmul.msk.f32.gmra.mxu2 %vm387_vm1, %v1118_v35  ;;  %938 = vmatmul.msk.f32.gmra.mxu3 %vm387_vm1, %v1118_v35 }
  0x3f   : > { %932 = vmatmul.msk.f32.gmra.mxu0 %vm387_vm1, %v353_v14  ;;  %934 = vmatmul.msk.f32.gmra.mxu1 %vm387_vm1, %v353_v14 }
  0xa2   : > { %v409_v15 = vpop.f32.mrf.mxu0  ;;  %v432_v16 = vpop.f32.mrf.mxu1 }
  0xa3   : > { %v460_v17 = vpop.f32.mrf.mxu2  ;;  %v483_v18 = vpop.f32.mrf.mxu3 }
  0xa4   : > { %v484_v24 = vadd.f32 %v483_v18, %v432_v16  ;;  %v461_v27 = vadd.f32 %v460_v17, %v409_v15 }
  0xa6   : > { %v627_v26 = vadd.f32 %v623_v25, %v484_v24  ;;  %v626_v35 = vadd.f32 %v622_v28, %v461_v27 }
  0xa8   : > { %v631_v31 = vmax.f32 %v627_v26, 0.0  ;;  %v630_v44 = vmax.f32 %v626_v35, 0.0 }
  0xaa   : > { %v650_v40 = vrot.slane %v631_v31, 6 }
  0xab   : > { %v463_v20 = vpop.f32.mrf.mxu2  ;;  %v486_v21 = vpop.f32.mrf.mxu3 }
  0xac   : > { %v412_v22 = vpop.f32.mrf.mxu0  ;;  %v435_v23 = vpop.f32.mrf.mxu1  ;;  %v657_v48 = vsel %vm656_vm3, %v630_v44, %v650_v40  ;;  %v663_v49 = vsel %vm662_vm5, %v630_v44, %v650_v40  ;;  %v669_v52 = vsel %vm658_vm4, %v630_v44, %v650_v40  ;;  %v673_v53 = vsel %vm664_vm6, %v650_v40, %v630_v44 }
  0xad   : > { %v487_v32 = vadd.f32 %v486_v21, %v435_v23  ;;  %v464_v54 = vadd.f32 %v463_v20, %v412_v22 }
  0xaf   : > { %v629_v43 = vadd.f32 %v623_v25, %v487_v32  ;;  %v628_v10 = vadd.f32 %v622_v28, %v464_v54 }
  0xb1   : > { %v633_v55 = vmax.f32 %v629_v43, 0.0  ;;  %v632_v19 = vmax.f32 %v628_v10, 0.0 }
  0xb3   : > { %v653_v16 = vrot.slane %v633_v55, 6 }
  0xb4   : > { %v545_v29 = vpop.f32.mrf.mxu0  ;;  %v568_v30 = vpop.f32.mrf.mxu1 }
  0xb5   : > { %v677_v22 = vsel %vm656_vm3, %v632_v19, %v653_v16  ;;  %v680_v23 = vsel %vm662_vm5, %v632_v19, %v653_v16  ;;  %v684_v24 = vsel %vm658_vm4, %v632_v19, %v653_v16  ;;  %v688_v26 = vsel %vm664_vm6, %v653_v16, %v632_v19 }
  0xb6   : > { %v591_v33 = vpop.f32.mrf.mxu2  ;;  %v614_v34 = vpop.f32.mrf.mxu3 }
  0xb7   : > { %v592_v36 = vadd.f32 %v591_v33, %v545_v29  ;;  %v615_v37 = vadd.f32 %v614_v34, %v568_v30 }
  0xb9   : > { %v634_v41 = vadd.f32 %v622_v28, %v592_v36  ;;  %v635_v42 = vadd.f32 %v623_v25, %v615_v37 }
  0xbb   : > { %v638_v45 = vmax.f32 %v634_v41, 0.0  ;;  %v639_v46 = vmax.f32 %v635_v42, 0.0 }
  0xbc   : > { %v548_v56 = vpop.f32.mrf.mxu0  ;;  %v571_v57 = vpop.f32.mrf.mxu1 }
  0xbd   : > { %v651_v50 = vrot.slane %v638_v45, 4  ;;  %v652_v51 = vrot.slane %v639_v46, 2 }
  0xbe   : > { %v594_v62 = vpop.f32.mrf.mxu2  ;;  %v617_v63 = vpop.f32.mrf.mxu3 }
  0xbf   : > { %v659_v58 = vsel %vm658_vm4, %v651_v50, %v652_v51  ;;  %v665_v59 = vsel %vm664_vm6, %v652_v51, %v651_v50  ;;  %v670_v60 = vsel %vm656_vm3, %v651_v50, %v652_v51  ;;  %v674_v61 = vsel %vm662_vm5, %v651_v50, %v652_v51 }
  0xc0   : > { %v661_v0 = vsel %vm660_vm7, %v657_v48, %v659_v58  ;;  %v667_v1 = vsel %vm666_vm8, %v663_v49, %v665_v59  ;;  %v671_v2 = vsel %vm660_vm7, %v670_v60, %v669_v52  ;;  %v675_v3 = vsel %vm666_vm8, %v674_v61, %v673_v53 }
  0xc1   : > { %v668_v4 = vrot.slane %v667_v1, 2  ;;  %v672_v5 = vrot.slane %v671_v2, 4  ;;  %v676_v6 = vrot.slane %v675_v3, 6  ;;  %v703_v7 = vperm.slane %v661_v0, %v1157_v47 }
  0xc2   : > { %v595_v8 = vadd.f32 %v594_v62, %v548_v56  ;;  %v618_v9 = vadd.f32 %v617_v63, %v571_v57 }
  0xc3   : > { %v707_v11 = vperm.slane %v668_v4, %v1157_v47  ;;  %v711_v12 = vperm.slane %v672_v5, %v1157_v47  ;;  %v715_v13 = vperm.slane %v676_v6, %v1157_v47  ;;  %740 = vst [vmem:[#allocation1] ss:$2 sm:$0xff] %v703_v7 }
  0xc4   : > { %v636_v14 = vadd.f32 %v622_v28, %v595_v8  ;;  %v637_v15 = vadd.f32 %v623_v25, %v618_v9 }
  0xc5   : > { %742 = vst [vmem:[#allocation1 + $0x1] ss:$2 sm:$0xff] %v707_v11 }
  0xc6   : > { %744 = vst [vmem:[#allocation1 + $0x10] ss:$2 sm:$0xff] %v711_v12  ;;  %v640_v17 = vmax.f32 %v636_v14, 0.0  ;;  %v641_v18 = vmax.f32 %v637_v15, 0.0 }
  0xc7   : > { %746 = vst [vmem:[#allocation1 + $0x11] ss:$2 sm:$0xff] %v715_v13 }
  0xc8   : > { %v654_v20 = vrot.slane %v640_v17, 4  ;;  %v655_v21 = vrot.slane %v641_v18, 2 }
  0xca   : > { %v678_v25 = vsel %vm658_vm4, %v654_v20, %v655_v21  ;;  %v681_v27 = vsel %vm664_vm6, %v655_v21, %v654_v20  ;;  %v685_v28 = vsel %vm656_vm3, %v654_v20, %v655_v21  ;;  %v689_v29 = vsel %vm662_vm5, %v654_v20, %v655_v21 }
  0xcb   : > { %v679_v30 = vsel %vm660_vm7, %v677_v22, %v678_v25  ;;  %v682_v31 = vsel %vm666_vm8, %v680_v23, %v681_v27  ;;  %v686_v32 = vsel %vm660_vm7, %v685_v28, %v684_v24  ;;  %v690_v33 = vsel %vm666_vm8, %v689_v29, %v688_v26 }
  0xcc   : > { %v755_v34 = vld.sshfl [vmem:[#allocation1] sm:$0xff pattern:$0x75316420]  ;;  %v756_v35 = vld.sshfl [vmem:[#allocation1 + $0x8] sm:$0xff pattern:$0x75316420]  ;;  %v719_v41 = vperm.slane %v679_v30, %v1157_v47 }
  0xcd   : > { %771 = vst [vmem:[%s1183_s24] sm:$0xff] %v755_v34  ;;  %v683_v36 = vrot.slane %v682_v31, 2  ;;  %v687_v37 = vrot.slane %v686_v32, 4  ;;  %v691_v38 = vrot.slane %v690_v33, 6 }
  0xce   : > { %v757_v39 = vld.sshfl [vmem:[#allocation1 + $0x10] sm:$0xff pattern:$0x75316420]  ;;  %v758_v40 = vld.sshfl [vmem:[#allocation1 + $0x18] sm:$0xff pattern:$0x75316420] }
  0xcf   : > { %772 = vst [vmem:[%s1183_s24 + $0x8] sm:$0xff] %v756_v35  ;;  %v723_v42 = vperm.slane %v683_v36, %v1157_v47  ;;  %v727_v43 = vperm.slane %v687_v37, %v1157_v47  ;;  %v731_v44 = vperm.slane %v691_v38, %v1157_v47 }
  0xd0   : > { %773 = vst [vmem:[%s1183_s24 + $0x10] sm:$0xff] %v757_v39 }
  0xd1   : > { %774 = vst [vmem:[%s1183_s24 + $0x18] sm:$0xff] %v758_v40 }
  0xd2   : > { %748 = vst [vmem:[#allocation1 + $0x20] ss:$2 sm:$0xff] %v719_v41 }
  0xd3   : > { %750 = vst [vmem:[#allocation1 + $0x21] ss:$2 sm:$0xff] %v723_v42 }
  0xd4   : > { %752 = vst [vmem:[#allocation1 + $0x30] ss:$2 sm:$0xff] %v727_v43 }
  0xd5   : > { %754 = vst [vmem:[#allocation1 + $0x31] ss:$2 sm:$0xff] %v731_v44 }
  0xda   : > { %v759_v45 = vld.sshfl [vmem:[#allocation1 + $0x20] sm:$0xff pattern:$0x75316420]  ;;  %v760_v46 = vld.sshfl [vmem:[#allocation1 + $0x28] sm:$0xff pattern:$0x75316420] }
  0xdb   : > { %775 = vst [vmem:[%s1183_s24 + $0x20] sm:$0xff] %v759_v45 }
  0xdc   : > { %v761_v48 = vld.sshfl [vmem:[#allocation1 + $0x30] sm:$0xff pattern:$0x75316420]  ;;  %v762_v49 = vld.sshfl [vmem:[#allocation1 + $0x38] sm:$0xff pattern:$0x75316420] }
  0xdd   : > { %776 = vst [vmem:[%s1183_s24 + $0x28] sm:$0xff] %v760_v46 }
  0xde   : > { %777 = vst [vmem:[%s1183_s24 + $0x30] sm:$0xff] %v761_v48 }
  0xdf   : > { %778 = vst [vmem:[%s1183_s24 + $0x38] sm:$0xff] %v762_v49 }
  0xe0 PF: > { %s16_s20 = sadd.s32 1, %s1039_s20   ;;  %s1220_s18 = smov %s1035_s19 }
  0xe1   : > { %p13_p8 = scmp.ge.s32.totalorder %s16_s20, 4   ;;  %s1221_s19 = smov %s1223_s22 }
  0xe3   :  { %15 = sbr.rel (!%p13_p8) target bundleno = 2 (0x2), region = 91 }
  0xe8   :  { %811 = vsyncpa [#allocation3], 1 }
  0xe9   :  { %813 = vsyncpa [#allocation3 + $0x1], 1 }

// kernel: _lambda_.3
= control target key start
LH: loop header
LB: loop body
LE: loop exit
PB: predicated region body
PF: predicated region fallthrough
CT: control target
= control target key end

     0   :  { %10 = vsyncpa [#allocation3], 0  ;;  %s1721_s18 = smov 0   ;;  %s1723_s19 = smov 0   ;;  %s2033_s0 = inlined_call_operand.vmem [shape: f32[2,32,256], index: 0, kind: input, shape index: {}, may-alias: {0,1,2}]   ;;  %s2034_s1 = inlined_call_operand.vmem [shape: f32[2,32,256], index: 1, kind: input, shape index: {}, may-alias: {0,1,2}]   ;;  %s2035_s2 = inlined_call_operand.vmem [shape: f32[2,32,256], index: 2, kind: input, shape index: {}, may-alias: {0,1,2}]   ;;  %s2036_s3 = inlined_call_operand.hbm [shape: f32[4,256,256], index: 3, kind: input, shape index: {}]   ;;  %s2037_s4 = inlined_call_operand.vmem [shape: f32[1,256], index: 4, kind: input, shape index: {}]   ;;  %s2038_s5 = inlined_call_operand.vmem [shape: f32[2,64,256], index: 5, kind: output, shape index: {}]  }
   0x1   :  { %s1725_s20 = smov 0  }
   0x2 LB: > { %s1569_s21 = sadd.s32 4294967295, %s1685_s20   ;;  %s28_s22 = sadd.s32 1, %s1681_s19  ;;  %s1685_s20 = sphi %s1725_s20, %s16_s20   ;;  %s1681_s19 = sphi %s1723_s19, %s2040_s19   ;;  %s1677_s18 = sphi %s1721_s18, %s2039_s18  }
   0x3   : > { %p30_p0 = scmp.ge.s32.totalorder %s28_s22, 2  ;;  %p1571_p1 = scmp.ge.s32.totalorder %s1685_s20, 1 }
   0x4   : > { %p183_p2 = scmp.lt.s32.totalorder %s1685_s20, 3  ;;  %p1599_p4 = scmp.eq.s32.totalorder %s1569_s21, 0 }
   0x5   : > { %s2042_s22 = smov (%p30_p0, %s28_s22), 0  ;;  %s194_s25 = sshll.u32 %s2036_s3, 4  ;;  %s195_s25 = int_to_ptr.hbm [resolvable:$true] %s194_s25 }
   0x6   : > { %p184_p3 = pnand %p1571_p1, %p183_p2  ;;  %s1687_s26 = smov [#allocation2]  }
   0x7   : > { %s196_s27 = sshll.u32 %s1687_s26, 4  ;;  %s1688_s28 = smov 256   ;;  %s197_s27 = int_to_ptr.vmem [resolvable:$true] %s196_s27 }
   0x8   : > { %p1595_p5 = pneg %p184_p3  ;;  %s1689_s29 = smov 16  }
   0x9   : > { %245 = sbr.rel (%p184_p3) target bundleno = 360 (0x168), region = 40 }
   0xa   : > { %p1596_p6 = pnand %p1599_p4, %p1595_p5 }
   0xc   : > { %1598 = dma.hbm_to_vmem [thread:$0]  (!%p1596_p6), %s195_s25, 32768, %s197_s27, [#allocation3], %s1688_s28, %s1688_s28, %s1689_s29  }
   0xe   : > { %1672 = dma.done.wait (%p1599_p4), [#allocation3], 32768  }
   0xf   : > { %1674 = vsyncadd (%p1599_p4), [#allocation3], 4294934528  ;;  %v510_v0 = vld [vmem:[#allocation2 + $0x2f0] sm:$0xff]  ;;  %v511_v1 = vld [vmem:[#allocation2 + $0x2f8] sm:$0xff]  ;;  %p295_p7 = scmp.lt.s32.totalorder %s1677_s18, 1  ;;  %vm360_vm0 = vcmask 1040384  }
  0x10   : > { %v543_v2 = vld [vmem:[#allocation2 + $0x3f8] sm:$0xff]  ;;  %544 = vmatpush.msra.mxu0 %v510_v0  ;;  %602 = vmatpush.msra.mxu2 %v511_v1  ;;  %v508_v3 = vld [vmem:[#allocation2 + $0x2e0] sm:$0xff]  ;;  %v542_v4 = vld [vmem:[#allocation2 + $0x3f0] sm:$0xff]  ;;  %vm385_vm1 = vcmask 1046528   ;;  %vm1204_vm2 = vcmask 1041408   ;;  %vm1206_vm3 = vcmask 1045508  }
  0x11   : > { %v509_v5 = vld [vmem:[#allocation2 + $0x2e8] sm:$0xff]  ;;  %631 = vmatpush.msra.mxu3 %v543_v2  ;;  %573 = vmatpush.msra.mxu1 %v542_v4  ;;  %v506_v7 = vld [vmem:[#allocation2 + $0x2d0] sm:$0xff]  ;;  %v540_v8 = vld [vmem:[#allocation2 + $0x3e0] sm:$0xff]  ;;  %s2044_s18 = smov (!%p295_p7, %s1677_s18), 1  ;;  %vm1210_vm4 = vcmask 1043458   ;;  %vm1212_vm5 = vcmask 1045504  }
  0x12   : > { %v541_v6 = vld [vmem:[#allocation2 + $0x3e8] sm:$0xff]  ;;  %545 = vmatpush.msra.mxu0 %v508_v3  ;;  %603 = vmatpush.msra.mxu2 %v509_v5  ;;  %v507_v9 = vld [vmem:[#allocation2 + $0x2d8] sm:$0xff]  ;;  %v504_v11 = vld [vmem:[#allocation2 + $0x2c0] sm:$0xff]  ;;  %s1752_s30 = sshll.u32 %s2044_s18, 6  ;;  %vm1208_vm6 = vcmask 1043456   ;;  %vm1214_vm7 = vcmask 1045506  }
  0x13   : > { %v539_v10 = vld [vmem:[#allocation2 + $0x3d8] sm:$0xff]  ;;  %632 = vmatpush.msra.mxu3 %v541_v6  ;;  %574 = vmatpush.msra.mxu1 %v540_v8  ;;  %v538_v12 = vld [vmem:[#allocation2 + $0x3d0] sm:$0xff]  ;;  %v505_v13 = vld [vmem:[#allocation2 + $0x2c8] sm:$0xff]  ;;  %s1758_s8 = scalar_lea.vmem %s2033_s0, %s1752_s30  ;;  %s309_s11 = scalar_lea.vmem %s2034_s1, %s1752_s30 }
  0x14   : > { %546 = vmatpush.msra.mxu0 %v506_v7  ;;  %604 = vmatpush.msra.mxu2 %v507_v9  ;;  %v537_v14 = vld [vmem:[#allocation2 + $0x3c8] sm:$0xff]  ;;  %v536_v15 = vld [vmem:[#allocation2 + $0x3c0] sm:$0xff]  ;;  %v502_v16 = vld [vmem:[#allocation2 + $0x2b0] sm:$0xff]  ;;  %s314_s14 = scalar_lea.vmem %s2035_s2, %s1752_s30  ;;  %s1590_s17 = sshll.u32 %s2044_s18, 7 }
  0x15   : > { %633 = vmatpush.msra.mxu3 %v539_v10  ;;  %575 = vmatpush.msra.mxu1 %v538_v12  ;;  %v503_v17 = vld [vmem:[#allocation2 + $0x2b8] sm:$0xff]  ;;  %v534_v19 = vld [vmem:[#allocation2 + $0x3b0] sm:$0xff]  ;;  %v500_v20 = vld [vmem:[#allocation2 + $0x2a0] sm:$0xff]  ;;  %s1956_s24 = scalar_lea.vmem %s2038_s5, %s1590_s17 }
  0x16   : > { %547 = vmatpush.msra.mxu0 %v504_v11  ;;  %605 = vmatpush.msra.mxu2 %v505_v13  ;;  %v535_v18 = vld [vmem:[#allocation2 + $0x3b8] sm:$0xff]  ;;  %v501_v21 = vld [vmem:[#allocation2 + $0x2a8] sm:$0xff]  ;;  %v532_v23 = vld [vmem:[#allocation2 + $0x3a0] sm:$0xff] }
  0x17   : > { %634 = vmatpush.msra.mxu3 %v537_v14  ;;  %576 = vmatpush.msra.mxu1 %v536_v15  ;;  %v533_v22 = vld [vmem:[#allocation2 + $0x3a8] sm:$0xff]  ;;  %v498_v24 = vld [vmem:[#allocation2 + $0x290] sm:$0xff]  ;;  %v499_v25 = vld [vmem:[#allocation2 + $0x298] sm:$0xff] }
  0x18   : > { %548 = vmatpush.msra.mxu0 %v502_v16  ;;  %606 = vmatpush.msra.mxu2 %v503_v17  ;;  %v531_v26 = vld [vmem:[#allocation2 + $0x398] sm:$0xff]  ;;  %v530_v27 = vld [vmem:[#allocation2 + $0x390] sm:$0xff]  ;;  %v496_v28 = vld [vmem:[#allocation2 + $0x280] sm:$0xff] }
  0x19   : > { %635 = vmatpush.msra.mxu3 %v535_v18  ;;  %577 = vmatpush.msra.mxu1 %v534_v19  ;;  %v497_v29 = vld [vmem:[#allocation2 + $0x288] sm:$0xff]  ;;  %v528_v31 = vld [vmem:[#allocation2 + $0x380] sm:$0xff]  ;;  %v494_v32 = vld [vmem:[#allocation2 + $0x270] sm:$0xff] }
  0x1a   : > { %549 = vmatpush.msra.mxu0 %v500_v20  ;;  %607 = vmatpush.msra.mxu2 %v501_v21  ;;  %v529_v30 = vld [vmem:[#allocation2 + $0x388] sm:$0xff]  ;;  %v495_v33 = vld [vmem:[#allocation2 + $0x278] sm:$0xff]  ;;  %v526_v35 = vld [vmem:[#allocation2 + $0x370] sm:$0xff] }
  0x1b   : > { %636 = vmatpush.msra.mxu3 %v533_v22  ;;  %578 = vmatpush.msra.mxu1 %v532_v23  ;;  %v527_v34 = vld [vmem:[#allocation2 + $0x378] sm:$0xff]  ;;  %v492_v36 = vld [vmem:[#allocation2 + $0x260] sm:$0xff]  ;;  %v493_v37 = vld [vmem:[#allocation2 + $0x268] sm:$0xff] }
  0x1c   : > { %550 = vmatpush.msra.mxu0 %v498_v24  ;;  %608 = vmatpush.msra.mxu2 %v499_v25  ;;  %v525_v38 = vld [vmem:[#allocation2 + $0x368] sm:$0xff]  ;;  %v524_v39 = vld [vmem:[#allocation2 + $0x360] sm:$0xff]  ;;  %v490_v40 = vld [vmem:[#allocation2 + $0x250] sm:$0xff] }
  0x1d   : > { %637 = vmatpush.msra.mxu3 %v531_v26  ;;  %579 = vmatpush.msra.mxu1 %v530_v27  ;;  %v491_v41 = vld [vmem:[#allocation2 + $0x258] sm:$0xff]  ;;  %v522_v43 = vld [vmem:[#allocation2 + $0x350] sm:$0xff]  ;;  %v488_v44 = vld [vmem:[#allocation2 + $0x240] sm:$0xff] }
  0x1e   : > { %551 = vmatpush.msra.mxu0 %v496_v28  ;;  %609 = vmatpush.msra.mxu2 %v497_v29  ;;  %v523_v42 = vld [vmem:[#allocation2 + $0x358] sm:$0xff]  ;;  %v489_v45 = vld [vmem:[#allocation2 + $0x248] sm:$0xff]  ;;  %v520_v47 = vld [vmem:[#allocation2 + $0x340] sm:$0xff] }
  0x1f   : > { %638 = vmatpush.msra.mxu3 %v529_v30  ;;  %580 = vmatpush.msra.mxu1 %v528_v31  ;;  %v521_v46 = vld [vmem:[#allocation2 + $0x348] sm:$0xff]  ;;  %v486_v48 = vld [vmem:[#allocation2 + $0x230] sm:$0xff]  ;;  %v487_v49 = vld [vmem:[#allocation2 + $0x238] sm:$0xff] }
  0x20   : > { %552 = vmatpush.msra.mxu0 %v494_v32  ;;  %610 = vmatpush.msra.mxu2 %v495_v33  ;;  %v519_v50 = vld [vmem:[#allocation2 + $0x338] sm:$0xff]  ;;  %v518_v51 = vld [vmem:[#allocation2 + $0x330] sm:$0xff]  ;;  %v484_v52 = vld [vmem:[#allocation2 + $0x220] sm:$0xff] }
  0x21   : > { %639 = vmatpush.msra.mxu3 %v527_v34  ;;  %581 = vmatpush.msra.mxu1 %v526_v35  ;;  %v485_v53 = vld [vmem:[#allocation2 + $0x228] sm:$0xff]  ;;  %v516_v55 = vld [vmem:[#allocation2 + $0x320] sm:$0xff]  ;;  %v482_v56 = vld [vmem:[#allocation2 + $0x210] sm:$0xff] }
  0x22   : > { %553 = vmatpush.msra.mxu0 %v492_v36  ;;  %611 = vmatpush.msra.mxu2 %v493_v37  ;;  %v517_v54 = vld [vmem:[#allocation2 + $0x328] sm:$0xff]  ;;  %v483_v57 = vld [vmem:[#allocation2 + $0x218] sm:$0xff]  ;;  %v514_v59 = vld [vmem:[#allocation2 + $0x310] sm:$0xff] }
  0x23   : > { %640 = vmatpush.msra.mxu3 %v525_v38  ;;  %582 = vmatpush.msra.mxu1 %v524_v39  ;;  %v515_v58 = vld [vmem:[#allocation2 + $0x318] sm:$0xff]  ;;  %v480_v60 = vld [vmem:[#allocation2 + $0x200] sm:$0xff]  ;;  %v481_v61 = vld [vmem:[#allocation2 + $0x208] sm:$0xff] }
  0x24   : > { %554 = vmatpush.msra.mxu0 %v490_v40  ;;  %612 = vmatpush.msra.mxu2 %v491_v41  ;;  %v513_v62 = vld [vmem:[#allocation2 + $0x308] sm:$0xff]  ;;  %v1761_v63 = vld [vmem:[%s1758_s8] sm:$0xff]  ;;  %v1764_v0 = vld [vmem:[%s1758_s8 + $0x8] sm:$0xff] }
  0x25   : > { %641 = vmatpush.msra.mxu3 %v523_v42  ;;  %583 = vmatpush.msra.mxu1 %v522_v43  ;;  %v446_v1 = vld [vmem:[#allocation2 + $0xf8] sm:$0xff]  ;;  %v512_v2 = vld [vmem:[#allocation2 + $0x300] sm:$0xff]  ;;  %v445_v3 = vld [vmem:[#allocation2 + $0xf0] sm:$0xff] }
  0x26   : > { %555 = vmatpush.msra.mxu0 %v488_v44  ;;  %613 = vmatpush.msra.mxu2 %v489_v45  ;;  %v478_v4 = vld [vmem:[#allocation2 + $0x1f8] sm:$0xff]  ;;  %v444_v5 = vld [vmem:[#allocation2 + $0xe8] sm:$0xff]  ;;  %v443_v6 = vld [vmem:[#allocation2 + $0xe0] sm:$0xff] }
  0x27   : > { %642 = vmatpush.msra.mxu3 %v521_v46  ;;  %584 = vmatpush.msra.mxu1 %v520_v47  ;;  %v477_v7 = vld [vmem:[#allocation2 + $0x1f0] sm:$0xff]  ;;  %v476_v8 = vld [vmem:[#allocation2 + $0x1e8] sm:$0xff]  ;;  %v442_v9 = vld [vmem:[#allocation2 + $0xd8] sm:$0xff] }
  0x28   : > { %556 = vmatpush.msra.mxu0 %v486_v48  ;;  %614 = vmatpush.msra.mxu2 %v487_v49  ;;  %v441_v10 = vld [vmem:[#allocation2 + $0xd0] sm:$0xff]  ;;  %v475_v11 = vld [vmem:[#allocation2 + $0x1e0] sm:$0xff]  ;;  %v474_v12 = vld [vmem:[#allocation2 + $0x1d8] sm:$0xff] }
  0x29   : > { %643 = vmatpush.msra.mxu3 %v519_v50  ;;  %585 = vmatpush.msra.mxu1 %v518_v51  ;;  %v440_v13 = vld [vmem:[#allocation2 + $0xc8] sm:$0xff]  ;;  %v439_v14 = vld [vmem:[#allocation2 + $0xc0] sm:$0xff]  ;;  %v473_v15 = vld [vmem:[#allocation2 + $0x1d0] sm:$0xff] }
  0x2a   : > { %557 = vmatpush.msra.mxu0 %v484_v52  ;;  %615 = vmatpush.msra.mxu2 %v485_v53  ;;  %v472_v16 = vld [vmem:[#allocation2 + $0x1c8] sm:$0xff]  ;;  %v1774_v18 = vld [vmem:[%s1758_s8 + $0x18] sm:$0xff]  ;;  %v438_v19 = vld [vmem:[#allocation2 + $0xb8] sm:$0xff] }
  0x2b   : > { %644 = vmatpush.msra.mxu3 %v517_v54  ;;  %586 = vmatpush.msra.mxu1 %v516_v55  ;;  %v1771_v17 = vld [vmem:[%s1758_s8 + $0x10] sm:$0xff]  ;;  %v437_v20 = vld [vmem:[#allocation2 + $0xb0] sm:$0xff]  ;;  %v471_v21 = vld [vmem:[#allocation2 + $0x1c0] sm:$0xff] }
  0x2c   : > { %558 = vmatpush.msra.mxu0 %v482_v56  ;;  %616 = vmatpush.msra.mxu2 %v483_v57  ;;  %v470_v22 = vld [vmem:[#allocation2 + $0x1b8] sm:$0xff]  ;;  %v436_v23 = vld [vmem:[#allocation2 + $0xa8] sm:$0xff]  ;;  %v435_v24 = vld [vmem:[#allocation2 + $0xa0] sm:$0xff] }
  0x2d   : > { %645 = vmatpush.msra.mxu3 %v515_v58  ;;  %587 = vmatpush.msra.mxu1 %v514_v59  ;;  %v469_v25 = vld [vmem:[#allocation2 + $0x1b0] sm:$0xff]  ;;  %v468_v26 = vld [vmem:[#allocation2 + $0x1a8] sm:$0xff]  ;;  %v434_v27 = vld [vmem:[#allocation2 + $0x98] sm:$0xff] }
  0x2e   : > { %559 = vmatpush.msra.mxu0 %v480_v60  ;;  %617 = vmatpush.msra.mxu2 %v481_v61  ;;  %v433_v28 = vld [vmem:[#allocation2 + $0x90] sm:$0xff]  ;;  %v467_v29 = vld [vmem:[#allocation2 + $0x1a0] sm:$0xff]  ;;  %v466_v30 = vld [vmem:[#allocation2 + $0x198] sm:$0xff] }
  0x2f   : > { %646 = vmatpush.msra.mxu3 %v513_v62  ;;  %560 = vmatmul.f32.vlgmr.msra.gmra.mxu0 %v1761_v63  ;;  %v432_v31 = vld [vmem:[#allocation2 + $0x88] sm:$0xff]  ;;  %v431_v32 = vld [vmem:[#allocation2 + $0x80] sm:$0xff]  ;;  %v465_v33 = vld [vmem:[#allocation2 + $0x190] sm:$0xff] }
  0x30   : > { %618 = vmatmul.f32.vlgmr.msra.gmra.mxu2 %v1761_v63  ;;  %647 = vmatmul.f32.vlgmr.msra.gmra.mxu3 %v1764_v0  ;;  %v464_v34 = vld [vmem:[#allocation2 + $0x188] sm:$0xff]  ;;  %v1781_v35 = vld [vmem:[%s1758_s8 + $0x20] sm:$0xff]  ;;  %v1784_v36 = vld [vmem:[%s1758_s8 + $0x28] sm:$0xff] }
  0x31   : > { %718 = vmatpush.msrb.mxu2 %v446_v1  ;;  %588 = vmatpush.msra.mxu1 %v512_v2  ;;  %v430_v37 = vld [vmem:[#allocation2 + $0x78] sm:$0xff]  ;;  %v429_v38 = vld [vmem:[#allocation2 + $0x70] sm:$0xff]  ;;  %v463_v39 = vld [vmem:[#allocation2 + $0x180] sm:$0xff] }
  0x32   : > { %660 = vmatpush.msrb.mxu0 %v445_v3  ;;  %747 = vmatpush.msrb.mxu3 %v478_v4  ;;  %v462_v40 = vld [vmem:[#allocation2 + $0x178] sm:$0xff]  ;;  %v428_v41 = vld [vmem:[#allocation2 + $0x68] sm:$0xff]  ;;  %v427_v42 = vld [vmem:[#allocation2 + $0x60] sm:$0xff] }
  0x33   : > { %589 = vmatmul.f32.vlgmr.msra.gmra.mxu1 %v1764_v0  ;;  %719 = vmatpush.msrb.mxu2 %v444_v5  ;;  %v461_v43 = vld [vmem:[#allocation2 + $0x170] sm:$0xff]  ;;  %v460_v44 = vld [vmem:[#allocation2 + $0x168] sm:$0xff]  ;;  %v426_v45 = vld [vmem:[#allocation2 + $0x58] sm:$0xff]  ;;  %v361_v5 = vrot.slane %v1761_v63, 7 }
  0x34   : > { %661 = vmatpush.msrb.mxu0 %v443_v6  ;;  %689 = vmatpush.msrb.mxu1 %v477_v7  ;;  %v425_v46 = vld [vmem:[#allocation2 + $0x50] sm:$0xff]  ;;  %v459_v47 = vld [vmem:[#allocation2 + $0x160] sm:$0xff]  ;;  %v458_v48 = vld [vmem:[#allocation2 + $0x158] sm:$0xff] }
  0x35   : > { %748 = vmatpush.msrb.mxu3 %v476_v8  ;;  %720 = vmatpush.msrb.mxu2 %v442_v9  ;;  %v424_v49 = vld [vmem:[#allocation2 + $0x48] sm:$0xff]  ;;  %v423_v50 = vld [vmem:[#allocation2 + $0x40] sm:$0xff]  ;;  %v457_v51 = vld [vmem:[#allocation2 + $0x150] sm:$0xff]  ;;  %v362_v9 = vrot.slane %v1764_v0, 7 }
  0x36   : > { %662 = vmatpush.msrb.mxu0 %v441_v10  ;;  %690 = vmatpush.msrb.mxu1 %v475_v11  ;;  %v1584_v52 = vld [vmem:[%s309_s11 + $0x7] ss:$8 sm:$0x3]  ;;  %v456_v53 = vld [vmem:[#allocation2 + $0x148] sm:$0xff]  ;;  %v1798_v55 = vld [vmem:[%s1758_s8 + $0x38] sm:$0xff] }
  0x37   : > { %749 = vmatpush.msrb.mxu3 %v474_v12  ;;  %721 = vmatpush.msrb.mxu2 %v440_v13  ;;  %v1795_v54 = vld [vmem:[%s1758_s8 + $0x30] sm:$0xff]  ;;  %v422_v56 = vld [vmem:[#allocation2 + $0x38] sm:$0xff]  ;;  %v421_v57 = vld [vmem:[#allocation2 + $0x30] sm:$0xff]  ;;  %v341_v58 = vmul.f32 0.0, %v1584_v52 }
  0x38   : > { %663 = vmatpush.msrb.mxu0 %v439_v14  ;;  %691 = vmatpush.msrb.mxu1 %v473_v15  ;;  %v455_v59 = vld [vmem:[#allocation2 + $0x140] sm:$0xff]  ;;  %v454_v60 = vld [vmem:[#allocation2 + $0x138] sm:$0xff]  ;;  %v420_v61 = vld [vmem:[#allocation2 + $0x28] sm:$0xff] }
  0x39   : > { %750 = vmatpush.msrb.mxu3 %v472_v16  ;;  %563 = vmatmul.f32.gmra.mxu0 %v1771_v17  ;;  %v419_v62 = vld [vmem:[#allocation2 + $0x20] sm:$0xff]  ;;  %v453_v1 = vld [vmem:[#allocation2 + $0x130] sm:$0xff]  ;;  %v452_v2 = vld [vmem:[#allocation2 + $0x128] sm:$0xff]  ;;  %v348_v4 = vperm.slane %v341_v58, 0  ;;  %v349_v8 = vperm.slane %v341_v58, 1 }
  0x3a   : > { %621 = vmatmul.f32.gmra.mxu2 %v1771_v17  ;;  %650 = vmatmul.f32.gmra.mxu3 %v1774_v18  ;;  %v418_v3 = vld [vmem:[#allocation2 + $0x18] sm:$0xff]  ;;  %v417_v6 = vld [vmem:[#allocation2 + $0x10] sm:$0xff]  ;;  %v451_v7 = vld [vmem:[#allocation2 + $0x120] sm:$0xff] }
  0x3b   : > { %722 = vmatpush.msrb.mxu2 %v438_v19  ;;  %664 = vmatpush.msrb.mxu0 %v437_v20  ;;  %v450_v10 = vld [vmem:[#allocation2 + $0x118] sm:$0xff]  ;;  %v416_v11 = vld [vmem:[#allocation2 + $0x8] sm:$0xff]  ;;  %v415_v12 = vld [vmem:[#allocation2] sm:$0xff]  ;;  %v383_v15 = vsel %vm360_vm0, %v348_v4, %v361_v5  ;;  %v384_v16 = vsel %vm360_vm0, %v349_v8, %v362_v9 }
  0x3c   : > { %692 = vmatpush.msrb.mxu1 %v471_v21  ;;  %751 = vmatpush.msrb.mxu3 %v470_v22  ;;  %v449_v13 = vld [vmem:[#allocation2 + $0x110] sm:$0xff]  ;;  %v448_v14 = vld [vmem:[#allocation2 + $0x108] sm:$0xff]  ;;  %v873_v19 = vld [vmem:[#allocation2 + $0x6f8] sm:$0xff] }
  0x3d   : > { %592 = vmatmul.f32.gmra.mxu1 %v1774_v18  ;;  %723 = vmatpush.msrb.mxu2 %v436_v23  ;;  %v447_v20 = vld [vmem:[#allocation2 + $0x100] sm:$0xff]  ;;  %v872_v21 = vld [vmem:[#allocation2 + $0x6f0] sm:$0xff]  ;;  %v905_v22 = vld [vmem:[#allocation2 + $0x7f8] sm:$0xff] }
  0x3e   : > { %665 = vmatpush.msrb.mxu0 %v435_v24  ;;  %693 = vmatpush.msrb.mxu1 %v469_v25  ;;  %v871_v23 = vld [vmem:[#allocation2 + $0x6e8] sm:$0xff]  ;;  %v870_v24 = vld [vmem:[#allocation2 + $0x6e0] sm:$0xff]  ;;  %v904_v25 = vld [vmem:[#allocation2 + $0x7f0] sm:$0xff] }
  0x3f   : > { %752 = vmatpush.msrb.mxu3 %v468_v26  ;;  %724 = vmatpush.msrb.mxu2 %v434_v27  ;;  %v903_v26 = vld [vmem:[#allocation2 + $0x7e8] sm:$0xff]  ;;  %v869_v27 = vld [vmem:[#allocation2 + $0x6d8] sm:$0xff]  ;;  %v894_v52 = vld [vmem:[#allocation2 + $0x7a0] sm:$0xff] }
  0x40   : > { %666 = vmatpush.msrb.mxu0 %v433_v28  ;;  %694 = vmatpush.msrb.mxu1 %v467_v29  ;;  %v363_v28 = vrot.slane %v1771_v17, 7  ;;  %v868_v29 = vld [vmem:[#allocation2 + $0x6d0] sm:$0xff]  ;;  %v858_v58 = vld [vmem:[#allocation2 + $0x680] sm:$0xff]  ;;  %v889_v4 = vld [vmem:[#allocation2 + $0x778] sm:$0xff] }
  0x41   : > { %753 = vmatpush.msrb.mxu3 %v466_v30  ;;  %725 = vmatpush.msrb.mxu2 %v432_v31  ;;  %v902_v30 = vld [vmem:[#allocation2 + $0x7e0] sm:$0xff]  ;;  %v365_v31 = vrot.slane %v1774_v18, 7  ;;  %v887_v8 = vld [vmem:[#allocation2 + $0x768] sm:$0xff] }
  0x42   : > { %667 = vmatpush.msrb.mxu0 %v431_v32  ;;  %695 = vmatpush.msrb.mxu1 %v465_v33  ;;  %v901_v32 = vld [vmem:[#allocation2 + $0x7d8] sm:$0xff]  ;;  %v867_v33 = vld [vmem:[#allocation2 + $0x6c8] sm:$0xff] }
  0x43   : > { %754 = vmatpush.msrb.mxu3 %v464_v34  ;;  %566 = vmatmul.f32.gmra.mxu0 %v1781_v35  ;;  %v866_v34 = vld [vmem:[#allocation2 + $0x6c0] sm:$0xff] }
  0x44   : > { %624 = vmatmul.f32.gmra.mxu2 %v1781_v35  ;;  %653 = vmatmul.f32.gmra.mxu3 %v1784_v36 }
  0x45   : > { %726 = vmatpush.msrb.mxu2 %v430_v37  ;;  %668 = vmatpush.msrb.mxu0 %v429_v38  ;;  %v900_v37 = vld [vmem:[#allocation2 + $0x7d0] sm:$0xff]  ;;  %v899_v38 = vld [vmem:[#allocation2 + $0x7c8] sm:$0xff] }
  0x46   : > { %696 = vmatpush.msrb.mxu1 %v463_v39  ;;  %755 = vmatpush.msrb.mxu3 %v462_v40  ;;  %v364_v39 = vsel %vm360_vm0, %v361_v5, %v363_v28  ;;  %v366_v40 = vsel %vm360_vm0, %v362_v9, %v365_v31  ;;  %v855_v5 = vld [vmem:[#allocation2 + $0x668] sm:$0xff]  ;;  %v853_v9 = vld [vmem:[#allocation2 + $0x658] sm:$0xff] }
  0x47   : > { %595 = vmatmul.f32.gmra.mxu1 %v1784_v36  ;;  %727 = vmatpush.msrb.mxu2 %v428_v41  ;;  %v865_v41 = vld [vmem:[#allocation2 + $0x6b8] sm:$0xff] }
  0x48   : > { %669 = vmatpush.msrb.mxu0 %v427_v42  ;;  %697 = vmatpush.msrb.mxu1 %v461_v43  ;;  %v864_v42 = vld [vmem:[#allocation2 + $0x6b0] sm:$0xff]  ;;  %v898_v43 = vld [vmem:[#allocation2 + $0x7c0] sm:$0xff] }
  0x49   : > { %756 = vmatpush.msrb.mxu3 %v460_v44  ;;  %728 = vmatpush.msrb.mxu2 %v426_v45  ;;  %v897_v44 = vld [vmem:[#allocation2 + $0x7b8] sm:$0xff]  ;;  %v863_v45 = vld [vmem:[#allocation2 + $0x6a8] sm:$0xff] }
  0x4a   : > { %670 = vmatpush.msrb.mxu0 %v425_v46  ;;  %698 = vmatpush.msrb.mxu1 %v459_v47  ;;  %v862_v46 = vld [vmem:[#allocation2 + $0x6a0] sm:$0xff]  ;;  %v896_v47 = vld [vmem:[#allocation2 + $0x7b0] sm:$0xff] }
  0x4b   : > { %757 = vmatpush.msrb.mxu3 %v458_v48  ;;  %729 = vmatpush.msrb.mxu2 %v424_v49  ;;  %v895_v48 = vld [vmem:[#allocation2 + $0x7a8] sm:$0xff]  ;;  %v861_v49 = vld [vmem:[#allocation2 + $0x698] sm:$0xff] }
  0x4c   : > { %671 = vmatpush.msrb.mxu0 %v423_v50  ;;  %699 = vmatpush.msrb.mxu1 %v457_v51  ;;  %v367_v50 = vrot.slane %v1781_v35, 7  ;;  %v860_v51 = vld [vmem:[#allocation2 + $0x690] sm:$0xff] }
  0x4d   : > { %758 = vmatpush.msrb.mxu3 %v456_v53  ;;  %569 = vmatmul.f32.gmra.mxu0 %v1795_v54  ;;  %v369_v53 = vrot.slane %v1784_v36, 7 }
  0x4e   : > { %627 = vmatmul.f32.gmra.mxu2 %v1795_v54  ;;  %656 = vmatmul.f32.gmra.mxu3 %v1798_v55 }
  0x4f   : > { %730 = vmatpush.msrb.mxu2 %v422_v56  ;;  %672 = vmatpush.msrb.mxu0 %v421_v57  ;;  %v893_v56 = vld [vmem:[#allocation2 + $0x798] sm:$0xff]  ;;  %v859_v57 = vld [vmem:[#allocation2 + $0x688] sm:$0xff] }
  0x50   : > { %700 = vmatpush.msrb.mxu1 %v455_v59  ;;  %759 = vmatpush.msrb.mxu3 %v454_v60  ;;  %v892_v59 = vld [vmem:[#allocation2 + $0x790] sm:$0xff]  ;;  %v891_v60 = vld [vmem:[#allocation2 + $0x788] sm:$0xff] }
  0x51   : > { %598 = vmatmul.f32.gmra.mxu1 %v1798_v55  ;;  %731 = vmatpush.msrb.mxu2 %v420_v61  ;;  %v368_v61 = vsel %vm360_vm0, %v363_v28, %v367_v50  ;;  %v846_v28 = vld [vmem:[#allocation2 + $0x620] sm:$0xff] }
  0x52   : > { %673 = vmatpush.msrb.mxu0 %v419_v62  ;;  %701 = vmatpush.msrb.mxu1 %v453_v1  ;;  %v370_v62 = vsel %vm360_vm0, %v365_v31, %v369_v53  ;;  %v857_v1 = vld [vmem:[#allocation2 + $0x678] sm:$0xff] }
  0x53   : > { %760 = vmatpush.msrb.mxu3 %v452_v2  ;;  %732 = vmatpush.msrb.mxu2 %v418_v3  ;;  %v856_v2 = vld [vmem:[#allocation2 + $0x670] sm:$0xff]  ;;  %v890_v3 = vld [vmem:[#allocation2 + $0x780] sm:$0xff]  ;;  %v845_v31 = vld [vmem:[#allocation2 + $0x618] sm:$0xff] }
  0x54   : > { %674 = vmatpush.msrb.mxu0 %v417_v6  ;;  %702 = vmatpush.msrb.mxu1 %v451_v7  ;;  %v854_v6 = vld [vmem:[#allocation2 + $0x660] sm:$0xff]  ;;  %v888_v7 = vld [vmem:[#allocation2 + $0x770] sm:$0xff] }
  0x55   : > { %761 = vmatpush.msrb.mxu3 %v450_v10  ;;  %733 = vmatpush.msrb.mxu2 %v416_v11  ;;  %v371_v10 = vrot.slane %v1795_v54, 7  ;;  %v852_v11 = vld [vmem:[#allocation2 + $0x650] sm:$0xff] }
  0x56   : > { %675 = vmatpush.msrb.mxu0 %v415_v12  ;;  %703 = vmatpush.msrb.mxu1 %v449_v13  ;;  %v886_v12 = vld [vmem:[#allocation2 + $0x760] sm:$0xff]  ;;  %v373_v13 = vrot.slane %v1798_v55, 7 }
  0x57   : > { %762 = vmatpush.msrb.mxu3 %v448_v14  ;;  %676 = vmatmul.f32.vlgmr.msrb.gmra.mxu0 %v383_v15  ;;  %v885_v14 = vld [vmem:[#allocation2 + $0x758] sm:$0xff] }
  0x58   : > { %734 = vmatmul.f32.vlgmr.msrb.gmra.mxu2 %v383_v15  ;;  %763 = vmatmul.f32.vlgmr.msrb.gmra.mxu3 %v384_v16  ;;  %v851_v15 = vld [vmem:[#allocation2 + $0x648] sm:$0xff] }
  0x59   : > { %964 = vmatpush.msra.mxu2 %v873_v19  ;;  %704 = vmatpush.msrb.mxu1 %v447_v20  ;;  %v884_v19 = vld [vmem:[#allocation2 + $0x750] sm:$0xff]  ;;  %v883_v20 = vld [vmem:[#allocation2 + $0x748] sm:$0xff] }
  0x5a   : > { %906 = vmatpush.msra.mxu0 %v872_v21  ;;  %993 = vmatpush.msra.mxu3 %v905_v22  ;;  %v372_v21 = vsel %vm360_vm0, %v367_v50, %v371_v10  ;;  %v374_v22 = vsel %vm360_vm0, %v369_v53, %v373_v13  ;;  %v806_v50 = vld [vmem:[#allocation2 + $0x4e8] sm:$0xff]  ;;  %v839_v53 = vld [vmem:[#allocation2 + $0x5f0] sm:$0xff] }
  0x5b   : > { %705 = vmatmul.f32.vlgmr.msrb.gmra.mxu1 %v384_v16  ;;  %965 = vmatpush.msra.mxu2 %v871_v23  ;;  %v850_v16 = vld [vmem:[#allocation2 + $0x640] sm:$0xff]  ;;  %v849_v23 = vld [vmem:[#allocation2 + $0x638] sm:$0xff]  ;;  %v798_v10 = vld [vmem:[#allocation2 + $0x4a8] sm:$0xff] }
  0x5c   : > { %907 = vmatpush.msra.mxu0 %v870_v24  ;;  %935 = vmatpush.msra.mxu1 %v904_v25  ;;  %v848_v24 = vld [vmem:[#allocation2 + $0x630] sm:$0xff]  ;;  %v882_v25 = vld [vmem:[#allocation2 + $0x740] sm:$0xff] }
  0x5d   : > { %994 = vmatpush.msra.mxu3 %v903_v26  ;;  %966 = vmatpush.msra.mxu2 %v869_v27  ;;  %v881_v26 = vld [vmem:[#allocation2 + $0x738] sm:$0xff]  ;;  %v847_v27 = vld [vmem:[#allocation2 + $0x628] sm:$0xff]  ;;  %v831_v13 = vld [vmem:[#allocation2 + $0x5b0] sm:$0xff] }
  0x5e   : > { %908 = vmatpush.msra.mxu0 %v868_v29  ;;  %936 = vmatpush.msra.mxu1 %v902_v30  ;;  %v880_v29 = vld [vmem:[#allocation2 + $0x730] sm:$0xff]  ;;  %v879_v30 = vld [vmem:[#allocation2 + $0x728] sm:$0xff] }
  0x5f   : > { %995 = vmatpush.msra.mxu3 %v901_v32  ;;  %967 = vmatpush.msra.mxu2 %v867_v33  ;;  %v386_v32 = vrot.slane %v1761_v63, 1  ;;  %v387_v33 = vrot.slane %v1771_v17, 1 }
  0x60   : > { %909 = vmatpush.msra.mxu0 %v866_v34  ;;  %937 = vmatpush.msra.mxu1 %v900_v37  ;;  %v844_v34 = vld [vmem:[#allocation2 + $0x610] sm:$0xff]  ;;  %v878_v37 = vld [vmem:[#allocation2 + $0x720] sm:$0xff] }
  0x61   : > { %996 = vmatpush.msra.mxu3 %v899_v38  ;;  %679 = vmatmul.f32.gmra.mxu0 %v364_v39  ;;  %v389_v38 = vrot.slane %v1764_v0, 1 }
  0x62   : > { %737 = vmatmul.f32.gmra.mxu2 %v364_v39  ;;  %766 = vmatmul.f32.gmra.mxu3 %v366_v40  ;;  %v390_v39 = vrot.slane %v1774_v18, 1 }
  0x63   : > { %968 = vmatpush.msra.mxu2 %v865_v41  ;;  %910 = vmatpush.msra.mxu0 %v864_v42  ;;  %v843_v41 = vld [vmem:[#allocation2 + $0x608] sm:$0xff]  ;;  %v842_v42 = vld [vmem:[#allocation2 + $0x600] sm:$0xff] }
  0x64   : > { %938 = vmatpush.msra.mxu1 %v898_v43  ;;  %997 = vmatpush.msra.mxu3 %v897_v44  ;;  %v876_v43 = vld [vmem:[#allocation2 + $0x710] sm:$0xff]  ;;  %v875_v44 = vld [vmem:[#allocation2 + $0x708] sm:$0xff] }
  0x65   : > { %708 = vmatmul.f32.gmra.mxu1 %v366_v40  ;;  %969 = vmatpush.msra.mxu2 %v863_v45  ;;  %v877_v40 = vld [vmem:[#allocation2 + $0x718] sm:$0xff]  ;;  %v388_v45 = vsel %vm385_vm1, %v386_v32, %v387_v33 }
  0x66   : > { %911 = vmatpush.msra.mxu0 %v862_v46  ;;  %939 = vmatpush.msra.mxu1 %v896_v47  ;;  %v391_v46 = vsel %vm385_vm1, %v389_v38, %v390_v39  ;;  %v808_v47 = vld [vmem:[#allocation2 + $0x4f8] sm:$0xff]  ;;  %v789_v38 = vld [vmem:[#allocation2 + $0x460] sm:$0xff] }
  0x67   : > { %998 = vmatpush.msra.mxu3 %v895_v48  ;;  %970 = vmatpush.msra.mxu2 %v861_v49  ;;  %v874_v48 = vld [vmem:[#allocation2 + $0x700] sm:$0xff]  ;;  %v807_v49 = vld [vmem:[#allocation2 + $0x4f0] sm:$0xff] }
  0x68   : > { %912 = vmatpush.msra.mxu0 %v860_v51  ;;  %940 = vmatpush.msra.mxu1 %v894_v52  ;;  %v840_v51 = vld [vmem:[#allocation2 + $0x5f8] sm:$0xff]  ;;  %v805_v52 = vld [vmem:[#allocation2 + $0x4e0] sm:$0xff] }
  0x69   : > { %999 = vmatpush.msra.mxu3 %v893_v56  ;;  %971 = vmatpush.msra.mxu2 %v859_v57  ;;  %v804_v56 = vld [vmem:[#allocation2 + $0x4d8] sm:$0xff]  ;;  %v838_v57 = vld [vmem:[#allocation2 + $0x5e8] sm:$0xff] }
  0x6a   : > { %913 = vmatpush.msra.mxu0 %v858_v58  ;;  %941 = vmatpush.msra.mxu1 %v892_v59  ;;  %v392_v58 = vrot.slane %v1781_v35, 1  ;;  %v803_v59 = vld [vmem:[#allocation2 + $0x4d0] sm:$0xff] }
  0x6b   : > { %1000 = vmatpush.msra.mxu3 %v891_v60  ;;  %682 = vmatmul.f32.gmra.mxu0 %v368_v61  ;;  %v837_v60 = vld [vmem:[#allocation2 + $0x5e0] sm:$0xff] }
  0x6c   : > { %740 = vmatmul.f32.gmra.mxu2 %v368_v61  ;;  %769 = vmatmul.f32.gmra.mxu3 %v370_v62  ;;  %v394_v61 = vrot.slane %v1784_v36, 1 }
  0x6d   : > { %972 = vmatpush.msra.mxu2 %v857_v1  ;;  %914 = vmatpush.msra.mxu0 %v856_v2  ;;  %v836_v1 = vld [vmem:[#allocation2 + $0x5d8] sm:$0xff]  ;;  %v801_v2 = vld [vmem:[#allocation2 + $0x4c0] sm:$0xff] }
  0x6e   : > { %942 = vmatpush.msra.mxu1 %v890_v3  ;;  %1001 = vmatpush.msra.mxu3 %v889_v4  ;;  %v835_v3 = vld [vmem:[#allocation2 + $0x5d0] sm:$0xff]  ;;  %v393_v4 = vsel %vm385_vm1, %v387_v33, %v392_v58  ;;  %v825_v33 = vld [vmem:[#allocation2 + $0x580] sm:$0xff] }
  0x6f   : > { %711 = vmatmul.f32.gmra.mxu1 %v370_v62  ;;  %973 = vmatpush.msra.mxu2 %v855_v5  ;;  %v802_v62 = vld [vmem:[#allocation2 + $0x4c8] sm:$0xff]  ;;  %v395_v5 = vsel %vm385_vm1, %v390_v39, %v394_v61  ;;  %v823_v39 = vld [vmem:[#allocation2 + $0x570] sm:$0xff] }
  0x70   : > { %915 = vmatpush.msra.mxu0 %v854_v6  ;;  %943 = vmatpush.msra.mxu1 %v888_v7  ;;  %v800_v6 = vld [vmem:[#allocation2 + $0x4b8] sm:$0xff]  ;;  %v834_v7 = vld [vmem:[#allocation2 + $0x5c8] sm:$0xff] }
  0x71   : > { %1002 = vmatpush.msra.mxu3 %v887_v8  ;;  %974 = vmatpush.msra.mxu2 %v853_v9  ;;  %v799_v8 = vld [vmem:[#allocation2 + $0x4b0] sm:$0xff]  ;;  %v833_v9 = vld [vmem:[#allocation2 + $0x5c0] sm:$0xff] }
  0x72   : > { %916 = vmatpush.msra.mxu0 %v852_v11  ;;  %944 = vmatpush.msra.mxu1 %v886_v12  ;;  %v832_v11 = vld [vmem:[#allocation2 + $0x5b8] sm:$0xff]  ;;  %v797_v12 = vld [vmem:[#allocation2 + $0x4a0] sm:$0xff] }
  0x73   : > { %1003 = vmatpush.msra.mxu3 %v885_v14  ;;  %975 = vmatpush.msra.mxu2 %v851_v15  ;;  %v796_v14 = vld [vmem:[#allocation2 + $0x498] sm:$0xff]  ;;  %v830_v15 = vld [vmem:[#allocation2 + $0x5a8] sm:$0xff] }
  0x74   : > { %917 = vmatpush.msra.mxu0 %v850_v16  ;;  %945 = vmatpush.msra.mxu1 %v884_v19  ;;  %v396_v16 = vrot.slane %v1795_v54, 1  ;;  %v795_v19 = vld [vmem:[#allocation2 + $0x490] sm:$0xff] }
  0x75   : > { %1004 = vmatpush.msra.mxu3 %v883_v20  ;;  %685 = vmatmul.f32.gmra.mxu0 %v372_v21  ;;  %v829_v20 = vld [vmem:[#allocation2 + $0x5a0] sm:$0xff] }
  0x76   : > { %743 = vmatmul.f32.gmra.mxu2 %v372_v21  ;;  %772 = vmatmul.f32.gmra.mxu3 %v374_v22  ;;  %v398_v21 = vrot.slane %v1798_v55, 1 }
  0x77   : > { %976 = vmatpush.msra.mxu2 %v849_v23  ;;  %918 = vmatpush.msra.mxu0 %v848_v24  ;;  %v828_v23 = vld [vmem:[#allocation2 + $0x598] sm:$0xff]  ;;  %v793_v24 = vld [vmem:[#allocation2 + $0x480] sm:$0xff] }
  0x78   : > { %946 = vmatpush.msra.mxu1 %v882_v25  ;;  %1005 = vmatpush.msra.mxu3 %v881_v26  ;;  %v827_v25 = vld [vmem:[#allocation2 + $0x590] sm:$0xff]  ;;  %v336_v26 = vld [vmem:[%s314_s14] ss:$8 sm:$0x3] }
  0x79   : > { %714 = vmatmul.f32.gmra.mxu1 %v374_v22  ;;  %977 = vmatpush.msra.mxu2 %v847_v27  ;;  %v794_v22 = vld [vmem:[#allocation2 + $0x488] sm:$0xff]  ;;  %v397_v27 = vsel %vm385_vm1, %v392_v58, %v396_v16  ;;  %v346_v32 = vmul.f32 0.0, %v336_v26 }
  0x7a   : > { %919 = vmatpush.msra.mxu0 %v846_v28  ;;  %947 = vmatpush.msra.mxu1 %v880_v29  ;;  %v399_v28 = vsel %vm385_vm1, %v394_v61, %v398_v21  ;;  %v792_v29 = vld [vmem:[#allocation2 + $0x478] sm:$0xff]  ;;  %v782_v58 = vld [vmem:[#allocation2 + $0x428] sm:$0xff]  ;;  %v815_v61 = vld [vmem:[#allocation2 + $0x530] sm:$0xff] }
  0x7b   : > { %1006 = vmatpush.msra.mxu3 %v879_v30  ;;  %978 = vmatpush.msra.mxu2 %v845_v31  ;;  %v826_v30 = vld [vmem:[#allocation2 + $0x588] sm:$0xff]  ;;  %v791_v31 = vld [vmem:[#allocation2 + $0x470] sm:$0xff] }
  0x7c   : > { %920 = vmatpush.msra.mxu0 %v844_v34  ;;  %948 = vmatpush.msra.mxu1 %v878_v37  ;;  %v790_v34 = vld [vmem:[#allocation2 + $0x468] sm:$0xff]  ;;  %v824_v37 = vld [vmem:[#allocation2 + $0x578] sm:$0xff] }
  0x7d   : > { %1007 = vmatpush.msra.mxu3 %v877_v40  ;;  %979 = vmatpush.msra.mxu2 %v843_v41  ;;  %v788_v40 = vld [vmem:[#allocation2 + $0x458] sm:$0xff]  ;;  %v822_v41 = vld [vmem:[#allocation2 + $0x568] sm:$0xff] }
  0x7e   : > { %921 = vmatpush.msra.mxu0 %v842_v42  ;;  %949 = vmatpush.msra.mxu1 %v876_v43  ;;  %v409_v42 = vperm.slane %v346_v32, 0  ;;  %v787_v43 = vld [vmem:[#allocation2 + $0x450] sm:$0xff] }
  0x7f   : > { %1008 = vmatpush.msra.mxu3 %v875_v44  ;;  %922 = vmatmul.f32.vlgmr.msra.gmra.mxu0 %v388_v45  ;;  %v821_v44 = vld [vmem:[#allocation2 + $0x560] sm:$0xff] }
  0x80   : > { %980 = vmatmul.f32.vlgmr.msra.gmra.mxu2 %v388_v45  ;;  %1009 = vmatmul.f32.vlgmr.msra.gmra.mxu3 %v391_v46  ;;  %v410_v45 = vperm.slane %v346_v32, 1 }
  0x81   : > { %1080 = vmatpush.msrb.mxu2 %v808_v47  ;;  %950 = vmatpush.msra.mxu1 %v874_v48  ;;  %v820_v47 = vld [vmem:[#allocation2 + $0x558] sm:$0xff]  ;;  %v785_v48 = vld [vmem:[#allocation2 + $0x440] sm:$0xff] }
  0x82   : > { %1022 = vmatpush.msrb.mxu0 %v807_v49  ;;  %951 = vmatmul.f32.vlgmr.msra.gmra.mxu1 %v391_v46  ;;  %v786_v46 = vld [vmem:[#allocation2 + $0x448] sm:$0xff]  ;;  %v819_v49 = vld [vmem:[#allocation2 + $0x550] sm:$0xff] }
  0x83   : > { %1081 = vmatpush.msrb.mxu2 %v806_v50  ;;  %1109 = vmatpush.msrb.mxu3 %v840_v51  ;;  %v413_v50 = vsel %vm385_vm1, %v396_v16, %v409_v42  ;;  %v414_v51 = vsel %vm385_vm1, %v398_v21, %v410_v45 }
  0x84   : > { %1023 = vmatpush.msrb.mxu0 %v805_v52  ;;  %1051 = vmatpush.msrb.mxu1 %v839_v53  ;;  %v784_v52 = vld [vmem:[#allocation2 + $0x438] sm:$0xff]  ;;  %v818_v53 = vld [vmem:[#allocation2 + $0x548] sm:$0xff] }
  0x85   : > { %1082 = vmatpush.msrb.mxu2 %v804_v56  ;;  %1110 = vmatpush.msrb.mxu3 %v838_v57  ;;  %v783_v56 = vld [vmem:[#allocation2 + $0x430] sm:$0xff]  ;;  %v817_v57 = vld [vmem:[#allocation2 + $0x540] sm:$0xff] }
  0x86   : > { %1024 = vmatpush.msrb.mxu0 %v803_v59  ;;  %1052 = vmatpush.msrb.mxu1 %v837_v60  ;;  %v816_v59 = vld [vmem:[#allocation2 + $0x538] sm:$0xff]  ;;  %v781_v60 = vld [vmem:[#allocation2 + $0x420] sm:$0xff] }
  0x87   : > { %1083 = vmatpush.msrb.mxu2 %v802_v62  ;;  %1111 = vmatpush.msrb.mxu3 %v836_v1  ;;  %v780_v62 = vld [vmem:[#allocation2 + $0x418] sm:$0xff]  ;;  %v814_v1 = vld [vmem:[#allocation2 + $0x528] sm:$0xff] }
  0x88   : > { %1025 = vmatpush.msrb.mxu0 %v801_v2  ;;  %1053 = vmatpush.msrb.mxu1 %v835_v3  ;;  %v779_v2 = vld [vmem:[#allocation2 + $0x410] sm:$0xff]  ;;  %v813_v3 = vld [vmem:[#allocation2 + $0x520] sm:$0xff] }
  0x89   : > { %925 = vmatmul.f32.gmra.mxu0 %v393_v4  ;;  %983 = vmatmul.f32.gmra.mxu2 %v393_v4  ;;  %v778_v4 = vld [vmem:[#allocation2 + $0x408] sm:$0xff] }
  0x8a   : > { %1012 = vmatmul.f32.gmra.mxu3 %v395_v5  ;;  %1084 = vmatpush.msrb.mxu2 %v800_v6  ;;  %v777_v6 = vld [vmem:[#allocation2 + $0x400] sm:$0xff] }
  0x8b   : > { %1112 = vmatpush.msrb.mxu3 %v834_v7  ;;  %1026 = vmatpush.msrb.mxu0 %v799_v8  ;;  %v811_v7 = vld [vmem:[#allocation2 + $0x510] sm:$0xff]  ;;  %v810_v8 = vld [vmem:[#allocation2 + $0x508] sm:$0xff] }
  0x8c   : > { %1054 = vmatpush.msrb.mxu1 %v833_v9  ;;  %1085 = vmatpush.msrb.mxu2 %v798_v10  ;;  %v809_v9 = vld [vmem:[#allocation2 + $0x500] sm:$0xff] }
  0x8d   : > { %954 = vmatmul.f32.gmra.mxu1 %v395_v5  ;;  %1113 = vmatpush.msrb.mxu3 %v832_v11  ;;  %v812_v5 = vld [vmem:[#allocation2 + $0x518] sm:$0xff] }
  0x8e   : > { %1027 = vmatpush.msrb.mxu0 %v797_v12  ;;  %1055 = vmatpush.msrb.mxu1 %v831_v13 }
  0x8f   : > { %1086 = vmatpush.msrb.mxu2 %v796_v14  ;;  %1114 = vmatpush.msrb.mxu3 %v830_v15 }
  0x90   : > { %1028 = vmatpush.msrb.mxu0 %v795_v19  ;;  %1056 = vmatpush.msrb.mxu1 %v829_v20 }
  0x91   : > { %1087 = vmatpush.msrb.mxu2 %v794_v22  ;;  %1115 = vmatpush.msrb.mxu3 %v828_v23 }
  0x92   : > { %1029 = vmatpush.msrb.mxu0 %v793_v24  ;;  %1057 = vmatpush.msrb.mxu1 %v827_v25 }
  0x93   : > { %928 = vmatmul.f32.gmra.mxu0 %v397_v27  ;;  %986 = vmatmul.f32.gmra.mxu2 %v397_v27 }
  0x94   : > { %1015 = vmatmul.f32.gmra.mxu3 %v399_v28  ;;  %1088 = vmatpush.msrb.mxu2 %v792_v29 }
  0x95   : > { %1116 = vmatpush.msrb.mxu3 %v826_v30  ;;  %1030 = vmatpush.msrb.mxu0 %v791_v31 }
  0x96   : > { %1058 = vmatpush.msrb.mxu1 %v825_v33  ;;  %1089 = vmatpush.msrb.mxu2 %v790_v34 }
  0x97   : > { %957 = vmatmul.f32.gmra.mxu1 %v399_v28  ;;  %1117 = vmatpush.msrb.mxu3 %v824_v37 }
  0x98   : > { %1031 = vmatpush.msrb.mxu0 %v789_v38  ;;  %1059 = vmatpush.msrb.mxu1 %v823_v39 }
  0x99   : > { %1090 = vmatpush.msrb.mxu2 %v788_v40  ;;  %1118 = vmatpush.msrb.mxu3 %v822_v41 }
  0x9a   : > { %1032 = vmatpush.msrb.mxu0 %v787_v43  ;;  %1060 = vmatpush.msrb.mxu1 %v821_v44 }
  0x9b   : > { %1091 = vmatpush.msrb.mxu2 %v786_v46  ;;  %1119 = vmatpush.msrb.mxu3 %v820_v47 }
  0x9c   : > { %1033 = vmatpush.msrb.mxu0 %v785_v48  ;;  %1061 = vmatpush.msrb.mxu1 %v819_v49 }
  0x9d   : > { %931 = vmatmul.f32.gmra.mxu0 %v413_v50  ;;  %989 = vmatmul.f32.gmra.mxu2 %v413_v50 }
  0x9e   : > { %1018 = vmatmul.f32.gmra.mxu3 %v414_v51  ;;  %1092 = vmatpush.msrb.mxu2 %v784_v52 }
  0x9f   : > { %1120 = vmatpush.msrb.mxu3 %v818_v53  ;;  %1034 = vmatpush.msrb.mxu0 %v783_v56 }
  0xa0   : > { %1062 = vmatpush.msrb.mxu1 %v817_v57  ;;  %1093 = vmatpush.msrb.mxu2 %v782_v58 }
  0xa1   : > { %960 = vmatmul.f32.gmra.mxu1 %v414_v51  ;;  %1121 = vmatpush.msrb.mxu3 %v816_v59 }
  0xa2   : > { %1035 = vmatpush.msrb.mxu0 %v781_v60  ;;  %1063 = vmatpush.msrb.mxu1 %v815_v61 }
  0xa3   : > { %1094 = vmatpush.msrb.mxu2 %v780_v62  ;;  %1122 = vmatpush.msrb.mxu3 %v814_v1 }
  0xa4   : > { %1036 = vmatpush.msrb.mxu0 %v779_v2  ;;  %1064 = vmatpush.msrb.mxu1 %v813_v3 }
  0xa5   : > { %1095 = vmatpush.msrb.mxu2 %v778_v4  ;;  %1123 = vmatpush.msrb.mxu3 %v812_v5 }
  0xa6   : > { %1037 = vmatpush.msrb.mxu0 %v777_v6  ;;  %1065 = vmatpush.msrb.mxu1 %v811_v7 }
  0xa7   : > { %1038 = vmatmul.f32.vlgmr.msrb.gmra.mxu0 %v1761_v63  ;;  %1096 = vmatmul.f32.vlgmr.msrb.gmra.mxu2 %v1761_v63 }
  0xa8   : > { %1124 = vmatpush.msrb.mxu3 %v810_v8  ;;  %1066 = vmatpush.msrb.mxu1 %v809_v9 }
  0xa9   : > { %1067 = vmatmul.f32.vlgmr.msrb.gmra.mxu1 %v1764_v0  ;;  %1125 = vmatmul.f32.vlgmr.msrb.gmra.mxu3 %v1764_v0 }
  0xac   : > { %v561_v10 = vpop.f32.mrf.mxu0 }
  0xaf   : > { %1041 = vmatmul.f32.gmra.mxu0 %v1771_v17  ;;  %1099 = vmatmul.f32.gmra.mxu2 %v1771_v17 }
  0xb0   : > { %v590_v11 = vpop.f32.mrf.mxu1 }
  0xb1   : > { %1070 = vmatmul.f32.gmra.mxu1 %v1774_v18  ;;  %1128 = vmatmul.f32.gmra.mxu3 %v1774_v18  ;;  %v591_v12 = vadd.f32 %v590_v11, %v561_v10 }
  0xb3   : > { %v619_v13 = vpop.f32.mrf.mxu2  ;;  %v648_v14 = vpop.f32.mrf.mxu3 }
  0xb4   : > { %v649_v63 = vadd.f32 %v648_v14, %v619_v13 }
  0xb6   : > { %v564_v15 = vpop.f32.mrf.mxu0 }
  0xb7   : > { %1044 = vmatmul.f32.gmra.mxu0 %v1781_v35  ;;  %1102 = vmatmul.f32.gmra.mxu2 %v1781_v35 }
  0xb9   : > { %1073 = vmatmul.f32.gmra.mxu1 %v1784_v36  ;;  %1131 = vmatmul.f32.gmra.mxu3 %v1784_v36 }
  0xba   : > { %v593_v0 = vpop.f32.mrf.mxu1 }
  0xbb   : > { %v594_v17 = vadd.f32 %v593_v0, %v564_v15 }
  0xbd   : > { %v622_v16 = vpop.f32.mrf.mxu2  ;;  %v651_v19 = vpop.f32.mrf.mxu3 }
  0xbe   : > { %v652_v20 = vadd.f32 %v651_v19, %v622_v16 }
  0xbf   : > { %1047 = vmatmul.f32.gmra.mxu0 %v1795_v54  ;;  %1105 = vmatmul.f32.gmra.mxu2 %v1795_v54 }
  0xc0   : > { %v567_v18 = vpop.f32.mrf.mxu0 }
  0xc1   : > { %1076 = vmatmul.f32.gmra.mxu1 %v1798_v55  ;;  %1134 = vmatmul.f32.gmra.mxu3 %v1798_v55  ;;  %v1138_v55 = vld [vmem:[%s2037_s4] sm:$0x3] }
  0xc2   : > { %v1861_v34 = vperm.slane %v1138_v55, 0  ;;  %v1863_v38 = vperm.slane %v1138_v55, 1 }
  0xc4   : > { %v596_v21 = vpop.f32.mrf.mxu1 }
  0xc5   : > { %v597_v35 = vadd.f32 %v596_v21, %v567_v18 }
  0xc7   : > { %v625_v22 = vpop.f32.mrf.mxu2  ;;  %v654_v23 = vpop.f32.mrf.mxu3 }
  0xc8   : > { %v655_v24 = vadd.f32 %v654_v23, %v625_v22 }
  0xca   : > { %v570_v36 = vpop.f32.mrf.mxu0 }
  0xce   : > { %v599_v25 = vpop.f32.mrf.mxu1 }
  0xcf   : > { %v600_v26 = vadd.f32 %v599_v25, %v570_v36 }
  0xd1   : > { %v628_v27 = vpop.f32.mrf.mxu2  ;;  %v657_v28 = vpop.f32.mrf.mxu3 }
  0xd2   : > { %v1856_v29 = vadd.f32 %v657_v28, %v628_v27 }
  0xd4   : > { %v677_v30 = vpop.f32.mrf.mxu0 }
  0xd5   : > { %v678_v31 = vadd.f32 %v677_v30, %v591_v12 }
  0xd8   : > { %v706_v54 = vpop.f32.mrf.mxu1 }
  0xd9   : > { %v707_v32 = vadd.f32 %v706_v54, %v678_v31 }
  0xdb   : > { %v735_v33 = vpop.f32.mrf.mxu2  ;;  %v764_v39 = vpop.f32.mrf.mxu3  ;;  %v1144_v43 = vadd.f32 %v1861_v34, %v707_v32 }
  0xdc   : > { %v736_v37 = vadd.f32 %v735_v33, %v649_v63 }
  0xdd   : > { %v1152_v48 = vmax.f32 %v1144_v43, 0.0 }
  0xde   : > { %v765_v40 = vadd.f32 %v764_v39, %v736_v37  ;;  %v680_v41 = vpop.f32.mrf.mxu0 }
  0xdf   : > { %v681_v42 = vadd.f32 %v680_v41, %v594_v17 }
  0xe0   : > { %v1145_v44 = vadd.f32 %v1863_v38, %v765_v40 }
  0xe2   : > { %v1153_v45 = vmax.f32 %v1145_v44, 0.0  ;;  %v709_v46 = vpop.f32.mrf.mxu1 }
  0xe3   : > { %v710_v47 = vadd.f32 %v709_v46, %v681_v42 }
  0xe4   : > { %v1192_v49 = vrot.slane %v1153_v45, 6 }
  0xe5   : > { %v738_v50 = vpop.f32.mrf.mxu2  ;;  %v767_v58 = vpop.f32.mrf.mxu3  ;;  %v1146_v62 = vadd.f32 %v1861_v34, %v710_v47 }
  0xe6   : > { %v1868_v51 = vsel %vm1204_vm2, %v1152_v48, %v1192_v49  ;;  %v1871_v52 = vsel %vm1210_vm4, %v1152_v48, %v1192_v49  ;;  %v1874_v53 = vsel %vm1206_vm3, %v1152_v48, %v1192_v49  ;;  %v1877_v56 = vsel %vm1212_vm5, %v1192_v49, %v1152_v48 }
  0xe7   : > { %v739_v57 = vadd.f32 %v738_v50, %v652_v20  ;;  %v1154_v5 = vmax.f32 %v1146_v62, 0.0 }
  0xe8   : > { %v683_v59 = vpop.f32.mrf.mxu0 }
  0xe9   : > { %v768_v60 = vadd.f32 %v767_v58, %v739_v57  ;;  %v684_v61 = vadd.f32 %v683_v59, %v597_v35 }
  0xeb   : > { %v1147_v1 = vadd.f32 %v1863_v38, %v768_v60 }
  0xec   : > { %v712_v2 = vpop.f32.mrf.mxu1 }
  0xed   : > { %v1155_v3 = vmax.f32 %v1147_v1, 0.0  ;;  %v713_v4 = vadd.f32 %v712_v2, %v684_v61 }
  0xef   : > { %v1195_v6 = vrot.slane %v1155_v3, 6  ;;  %v741_v7 = vpop.f32.mrf.mxu2  ;;  %v770_v13 = vpop.f32.mrf.mxu3  ;;  %v1148_v0 = vadd.f32 %v1861_v34, %v713_v4 }
  0xf0   : > { %v742_v8 = vadd.f32 %v741_v7, %v655_v24 }
  0xf1   : > { %v1882_v9 = vsel %vm1204_vm2, %v1154_v5, %v1195_v6  ;;  %v1885_v10 = vsel %vm1210_vm4, %v1154_v5, %v1195_v6  ;;  %v1888_v11 = vsel %vm1206_vm3, %v1154_v5, %v1195_v6  ;;  %v1891_v12 = vsel %vm1212_vm5, %v1195_v6, %v1154_v5 }
  0xf2   : > { %v771_v14 = vadd.f32 %v770_v13, %v742_v8  ;;  %v686_v63 = vpop.f32.mrf.mxu0  ;;  %v1156_v18 = vmax.f32 %v1148_v0, 0.0 }
  0xf3   : > { %v687_v15 = vadd.f32 %v686_v63, %v600_v26 }
  0xf4   : > { %v1149_v17 = vadd.f32 %v1863_v38, %v771_v14 }
  0xf6   : > { %v1157_v16 = vmax.f32 %v1149_v17, 0.0  ;;  %v715_v19 = vpop.f32.mrf.mxu1 }
  0xf7   : > { %v716_v20 = vadd.f32 %v715_v19, %v687_v15  ;;  %v1690_v19 = vmov 1935823168  }
  0xf8   : > { %v1198_v21 = vrot.slane %v1157_v16, 6 }
  0xf9   : > { %v744_v35 = vpop.f32.mrf.mxu2  ;;  %v773_v26 = vpop.f32.mrf.mxu3  ;;  %v1150_v30 = vadd.f32 %v1861_v34, %v716_v20  ;;  %v1287_v20 = vunpack.c.l.s4 %v1690_v19 }
  0xfa   : > { %v1896_v22 = vsel %vm1204_vm2, %v1156_v18, %v1198_v21  ;;  %v1899_v23 = vsel %vm1210_vm4, %v1156_v18, %v1198_v21  ;;  %v1902_v24 = vsel %vm1206_vm3, %v1156_v18, %v1198_v21  ;;  %v1905_v36 = vsel %vm1212_vm5, %v1198_v21, %v1156_v18 }
  0xfb   : > { %v745_v25 = vadd.f32 %v744_v35, %v1856_v29  ;;  %v1158_v55 = vmax.f32 %v1150_v30, 0.0 }
  0xfc   : > { %v923_v27 = vpop.f32.mrf.mxu0 }
  0xfd   : > { %v774_v28 = vadd.f32 %v773_v26, %v745_v25 }
  0xff   : > { %v1151_v31 = vadd.f32 %v1863_v38, %v774_v28  ;;  %v952_v54 = vpop.f32.mrf.mxu1  ;;  %v1928_v28 = vunpack.c.0.s8 %v1287_v20 }
 0x100   : > { %v953_v60 = vadd.f32 %v952_v54, %v923_v27 }
 0x101   : > { %v1159_v32 = vmax.f32 %v1151_v31, 0.0 }
 0x103   : > { %v1201_v33 = vrot.slane %v1159_v32, 6  ;;  %v981_v37 = vpop.f32.mrf.mxu2  ;;  %v1010_v42 = vpop.f32.mrf.mxu3 }
 0x104   : > { %v1011_v4 = vadd.f32 %v1010_v42, %v981_v37 }
 0x105   : > { %v1911_v39 = vsel %vm1204_vm2, %v1158_v55, %v1201_v33  ;;  %v1914_v40 = vsel %vm1210_vm4, %v1158_v55, %v1201_v33  ;;  %v1917_v29 = vsel %vm1206_vm3, %v1158_v55, %v1201_v33  ;;  %v1920_v41 = vsel %vm1212_vm5, %v1201_v33, %v1158_v55 }
 0x106   : > { %v926_v43 = vpop.f32.mrf.mxu0 }
 0x10a   : > { %v955_v44 = vpop.f32.mrf.mxu1 }
 0x10b   : > { %v956_v6 = vadd.f32 %v955_v44, %v926_v43 }
 0x10c   : > { %v984_v45 = vpop.f32.mrf.mxu2 }
 0x10d   : > { %v1013_v46 = vpop.f32.mrf.mxu3 }
 0x10e   : > { %v1014_v35 = vadd.f32 %v1013_v46, %v984_v45 }
 0x110   : > { %v929_v47 = vpop.f32.mrf.mxu0 }
 0x114   : > { %v958_v48 = vpop.f32.mrf.mxu1 }
 0x115   : > { %v959_v30 = vadd.f32 %v958_v48, %v929_v47 }
 0x116   : > { %v987_v49 = vpop.f32.mrf.mxu2 }
 0x117   : > { %v1016_v50 = vpop.f32.mrf.mxu3 }
 0x11a   : > { %v932_v57 = vpop.f32.mrf.mxu0 }
 0x11e   : > { %v961_v58 = vpop.f32.mrf.mxu1 }
 0x120   : > { %v1922_v59 = vpop.f32.mrf.mxu2 }
 0x121   : > { %v1924_v61 = vpop.f32.mrf.mxu3 }
 0x124   : > { %v1039_v62 = vpop.f32.mrf.mxu0 }
 0x125   : > { %v1040_v1 = vadd.f32 %v1039_v62, %v953_v60 }
 0x126   : > { %v1068_v2 = vpop.f32.mrf.mxu1 }
 0x127   : > { %v1069_v3 = vadd.f32 %v1068_v2, %v1040_v1 }
 0x129   : > { %v1160_v7 = vadd.f32 %v1861_v34, %v1069_v3 }
 0x12a   : > { %v1097_v5 = vpop.f32.mrf.mxu2 }
 0x12b   : > { %v1098_v8 = vadd.f32 %v1097_v5, %v1011_v4  ;;  %v1168_v17 = vmax.f32 %v1160_v7, 0.0  ;;  %v1017_v5 = vadd.f32 %v1016_v50, %v987_v49 }
 0x12c   : > { %v1042_v13 = vpop.f32.mrf.mxu0  ;;  %v1126_v14 = vpop.f32.mrf.mxu3 }
 0x12d   : > { %v1043_v63 = vadd.f32 %v1042_v13, %v956_v6  ;;  %v1127_v15 = vadd.f32 %v1126_v14, %v1098_v8  ;;  %v1193_v26 = vrot.slane %v1168_v17, 4  ;;  %v962_v13 = vadd.f32 %v961_v58, %v932_v57 }
 0x12e   : > { %v1071_v0 = vpop.f32.mrf.mxu1 }
 0x12f   : > { %v1161_v16 = vadd.f32 %v1863_v38, %v1127_v15  ;;  %v1072_v18 = vadd.f32 %v1071_v0, %v1043_v63 }
 0x131   : > { %v1169_v21 = vmax.f32 %v1161_v16, 0.0  ;;  %v1162_v31 = vadd.f32 %v1861_v34, %v1072_v18  ;;  %v1020_v18 = vadd.f32 %v1924_v61, %v1922_v59 }
 0x132   : > { %v1100_v25 = vpop.f32.mrf.mxu2 }
 0x133   : > { %v1194_v27 = vrot.slane %v1169_v21, 2  ;;  %v1101_v54 = vadd.f32 %v1100_v25, %v1014_v35 }
 0x134   : > { %v1045_v32 = vpop.f32.mrf.mxu0  ;;  %v1129_v55 = vpop.f32.mrf.mxu3 }
 0x135   : > { %v1207_v33 = vsel %vm1206_vm3, %v1193_v26, %v1194_v27  ;;  %v1213_v37 = vsel %vm1212_vm5, %v1194_v27, %v1193_v26  ;;  %v1218_v42 = vsel %vm1204_vm2, %v1193_v26, %v1194_v27  ;;  %v1222_v43 = vsel %vm1210_vm4, %v1193_v26, %v1194_v27 }
 0x136   : > { %v1209_v44 = vsel %vm1208_vm6, %v1868_v51, %v1207_v33  ;;  %v1215_v45 = vsel %vm1214_vm7, %v1871_v52, %v1213_v37  ;;  %v1219_v46 = vsel %vm1208_vm6, %v1218_v42, %v1874_v53  ;;  %v1223_v47 = vsel %vm1214_vm7, %v1222_v43, %v1877_v56  ;;  %v1074_v48 = vpop.f32.mrf.mxu1 }
 0x137   : > { %v1216_v60 = vrot.slane %v1215_v45, 2  ;;  %v1220_v62 = vrot.slane %v1219_v46, 4  ;;  %v1224_v1 = vrot.slane %v1223_v47, 6  ;;  %v1289_v2 = vperm.slane %v1209_v44, %v1928_v28 }
 0x138   : > { %v1046_v3 = vadd.f32 %v1045_v32, %v959_v30  ;;  %v1130_v4 = vadd.f32 %v1129_v55, %v1101_v54  ;;  %v1170_v53 = vmax.f32 %v1162_v31, 0.0 }
 0x139   : > { %v1293_v51 = vperm.slane %v1216_v60, %v1928_v28  ;;  %v1297_v52 = vperm.slane %v1220_v62, %v1928_v28  ;;  %v1301_v6 = vperm.slane %v1224_v1, %v1928_v28  ;;  %1366 = vst [vmem:[#allocation1] ss:$2 sm:$0xff] %v1289_v2 }
 0x13a   : > { %v1163_v56 = vadd.f32 %v1863_v38, %v1130_v4  ;;  %v1075_v7 = vadd.f32 %v1074_v48, %v1046_v3  ;;  %v1103_v8 = vpop.f32.mrf.mxu2  ;;  %v1196_v16 = vrot.slane %v1170_v53, 4 }
 0x13b   : > { %1368 = vst [vmem:[#allocation1 + $0x1] ss:$2 sm:$0xff] %v1293_v51  ;;  %v1104_v14 = vadd.f32 %v1103_v8, %v1017_v5 }
 0x13c   : > { %1370 = vst [vmem:[#allocation1 + $0x10] ss:$2 sm:$0xff] %v1297_v52  ;;  %v1171_v63 = vmax.f32 %v1163_v56, 0.0  ;;  %v1164_v49 = vadd.f32 %v1861_v34, %v1075_v7  ;;  %v1048_v50 = vpop.f32.mrf.mxu0  ;;  %v1132_v15 = vpop.f32.mrf.mxu3 }
 0x13d   : > { %1372 = vst [vmem:[#allocation1 + $0x11] ss:$2 sm:$0xff] %v1301_v6  ;;  %v1049_v0 = vadd.f32 %v1048_v50, %v962_v13  ;;  %v1133_v17 = vadd.f32 %v1132_v15, %v1104_v14 }
 0x13e   : > { %v1197_v19 = vrot.slane %v1171_v63, 2  ;;  %v1077_v20 = vpop.f32.mrf.mxu1  ;;  %v1172_v21 = vmax.f32 %v1164_v49, 0.0 }
 0x13f   : > { %v1165_v57 = vadd.f32 %v1863_v38, %v1133_v17  ;;  %v1078_v58 = vadd.f32 %v1077_v20, %v1049_v0 }
 0x140   : > { %v1226_v35 = vsel %vm1206_vm3, %v1196_v16, %v1197_v19  ;;  %v1229_v25 = vsel %vm1212_vm5, %v1197_v19, %v1196_v16  ;;  %v1233_v26 = vsel %vm1204_vm2, %v1196_v16, %v1197_v19  ;;  %v1237_v27 = vsel %vm1210_vm4, %v1196_v16, %v1197_v19 }
 0x141   : > { %v1227_v59 = vsel %vm1208_vm6, %v1882_v9, %v1226_v35  ;;  %v1230_v61 = vsel %vm1214_vm7, %v1885_v10, %v1229_v25  ;;  %v1234_v30 = vsel %vm1208_vm6, %v1233_v26, %v1888_v11  ;;  %v1238_v31 = vsel %vm1214_vm7, %v1237_v27, %v1891_v12 }
 0x142   : > { %v1231_v54 = vrot.slane %v1230_v61, 2  ;;  %v1235_v32 = vrot.slane %v1234_v30, 4  ;;  %v1239_v55 = vrot.slane %v1238_v31, 6  ;;  %v1305_v33 = vperm.slane %v1227_v59, %v1928_v28  ;;  %v1381_v37 = vld.sshfl [vmem:[#allocation1] sm:$0xff pattern:$0x75316420]  ;;  %v1106_v42 = vpop.f32.mrf.mxu2 }
 0x143   : > { %v1173_v43 = vmax.f32 %v1165_v57, 0.0  ;;  %v1382_v44 = vld.sshfl [vmem:[#allocation1 + $0x8] sm:$0xff pattern:$0x75316420]  ;;  %1421 = vst [vmem:[%s1956_s24] sm:$0xff] %v1381_v37  ;;  %v1166_v9 = vadd.f32 %v1861_v34, %v1078_v58  ;;  %v1107_v10 = vadd.f32 %v1106_v42, %v1020_v18  ;;  %v1199_v47 = vrot.slane %v1172_v21, 4 }
 0x144   : > { %v1309_v45 = vperm.slane %v1231_v54, %v1928_v28  ;;  %v1313_v11 = vperm.slane %v1235_v32, %v1928_v28  ;;  %v1317_v12 = vperm.slane %v1239_v55, %v1928_v28  ;;  %1374 = vst [vmem:[#allocation1 + $0x20] ss:$2 sm:$0xff] %v1305_v33  ;;  %v1135_v46 = vpop.f32.mrf.mxu3  ;;  %v1383_v60 = vld.sshfl [vmem:[#allocation1 + $0x10] sm:$0xff pattern:$0x75316420] }
 0x145   : > { %v1200_v48 = vrot.slane %v1173_v43, 2  ;;  %1422 = vst [vmem:[%s1956_s24 + $0x8] sm:$0xff] %v1382_v44  ;;  %v1174_v62 = vmax.f32 %v1166_v9, 0.0  ;;  %v1136_v1 = vadd.f32 %v1135_v46, %v1107_v10  ;;  %v1384_v5 = vld.sshfl [vmem:[#allocation1 + $0x18] sm:$0xff pattern:$0x75316420] }
 0x146   : > { %1376 = vst [vmem:[#allocation1 + $0x21] ss:$2 sm:$0xff] %v1309_v45 }
 0x147   : > { %1378 = vst [vmem:[#allocation1 + $0x30] ss:$2 sm:$0xff] %v1313_v11  ;;  %v1241_v34 = vsel %vm1206_vm3, %v1199_v47, %v1200_v48  ;;  %v1244_v2 = vsel %vm1212_vm5, %v1200_v48, %v1199_v47  ;;  %v1248_v3 = vsel %vm1204_vm2, %v1199_v47, %v1200_v48  ;;  %v1252_v4 = vsel %vm1210_vm4, %v1199_v47, %v1200_v48 }
 0x148   : > { %1380 = vst [vmem:[#allocation1 + $0x31] ss:$2 sm:$0xff] %v1317_v12  ;;  %v1242_v51 = vsel %vm1208_vm6, %v1896_v22, %v1241_v34  ;;  %v1245_v52 = vsel %vm1214_vm7, %v1899_v23, %v1244_v2  ;;  %v1249_v6 = vsel %vm1208_vm6, %v1248_v3, %v1902_v24  ;;  %v1253_v53 = vsel %vm1214_vm7, %v1252_v4, %v1905_v36 }
 0x149   : > { %v1246_v56 = vrot.slane %v1245_v52, 2  ;;  %v1250_v7 = vrot.slane %v1249_v6, 4  ;;  %v1254_v8 = vrot.slane %v1253_v53, 6  ;;  %v1321_v13 = vperm.slane %v1242_v51, %v1928_v28  ;;  %1423 = vst [vmem:[%s1956_s24 + $0x10] sm:$0xff] %v1383_v60 }
 0x14a   : > { %1424 = vst [vmem:[%s1956_s24 + $0x18] sm:$0xff] %v1384_v5  ;;  %v1167_v14 = vadd.f32 %v1863_v38, %v1136_v1  ;;  %v1202_v36 = vrot.slane %v1174_v62, 4 }
 0x14b   : > { %v1325_v22 = vperm.slane %v1246_v56, %v1928_v28  ;;  %v1329_v63 = vperm.slane %v1250_v7, %v1928_v28  ;;  %v1333_v23 = vperm.slane %v1254_v8, %v1928_v28  ;;  %1389 = vst [vmem:[#allocation1] ss:$2 sm:$0xff] %v1321_v13 }
 0x14c   : > { %v1175_v24 = vmax.f32 %v1167_v14, 0.0 }
 0x14d   : > { %1390 = vst [vmem:[#allocation1 + $0x1] ss:$2 sm:$0xff] %v1325_v22  ;;  %v1385_v49 = vld.sshfl [vmem:[#allocation1 + $0x20] sm:$0xff pattern:$0x75316420] }
 0x14e   : > { %1391 = vst [vmem:[#allocation1 + $0x10] ss:$2 sm:$0xff] %v1329_v63  ;;  %v1203_v50 = vrot.slane %v1175_v24, 2  ;;  %v1386_v15 = vld.sshfl [vmem:[#allocation1 + $0x28] sm:$0xff pattern:$0x75316420] }
 0x14f   : > { %1392 = vst [vmem:[#allocation1 + $0x11] ss:$2 sm:$0xff] %v1333_v23  ;;  %v1387_v38 = vld.sshfl [vmem:[#allocation1 + $0x30] sm:$0xff pattern:$0x75316420] }
 0x150   : > { %v1256_v0 = vsel %vm1206_vm3, %v1202_v36, %v1203_v50  ;;  %v1259_v17 = vsel %vm1212_vm5, %v1203_v50, %v1202_v36  ;;  %v1263_v16 = vsel %vm1204_vm2, %v1202_v36, %v1203_v50  ;;  %v1267_v19 = vsel %vm1210_vm4, %v1202_v36, %v1203_v50  ;;  %v1388_v20 = vld.sshfl [vmem:[#allocation1 + $0x38] sm:$0xff pattern:$0x75316420]  ;;  %1425 = vst [vmem:[%s1956_s24 + $0x20] sm:$0xff] %v1385_v49 }
 0x151   : > { %v1260_v18 = vsel %vm1214_vm7, %v1914_v40, %v1259_v17  ;;  %v1264_v21 = vsel %vm1208_vm6, %v1263_v16, %v1917_v29  ;;  %1426 = vst [vmem:[%s1956_s24 + $0x28] sm:$0xff] %v1386_v15  ;;  %v1268_v57 = vsel %vm1214_vm7, %v1267_v19, %v1920_v41  ;;  %v1257_v58 = vsel %vm1208_vm6, %v1911_v39, %v1256_v0 }
 0x152   : > { %1427 = vst [vmem:[%s1956_s24 + $0x30] sm:$0xff] %v1387_v38  ;;  %v1261_v35 = vrot.slane %v1260_v18, 2  ;;  %v1265_v25 = vrot.slane %v1264_v21, 4  ;;  %v1269_v40 = vrot.slane %v1268_v57, 6  ;;  %v1337_v61 = vperm.slane %v1257_v58, %v1928_v28 }
 0x153   : > { %1428 = vst [vmem:[%s1956_s24 + $0x38] sm:$0xff] %v1388_v20 }
 0x154   : > { %v1397_v26 = vld.sshfl [vmem:[#allocation1] sm:$0xff pattern:$0x75316420]  ;;  %v1398_v27 = vld.sshfl [vmem:[#allocation1 + $0x8] sm:$0xff pattern:$0x75316420]  ;;  %v1341_v41 = vperm.slane %v1261_v35, %v1928_v28  ;;  %v1345_v39 = vperm.slane %v1265_v25, %v1928_v28  ;;  %v1349_v30 = vperm.slane %v1269_v40, %v1928_v28 }
 0x155   : > { %1429 = vst [vmem:[%s1956_s24 + $0x40] sm:$0xff] %v1397_v26 }
 0x156   : > { %v1399_v59 = vld.sshfl [vmem:[#allocation1 + $0x10] sm:$0xff pattern:$0x75316420]  ;;  %v1400_v29 = vld.sshfl [vmem:[#allocation1 + $0x18] sm:$0xff pattern:$0x75316420] }
 0x157   : > { %1430 = vst [vmem:[%s1956_s24 + $0x48] sm:$0xff] %v1398_v27 }
 0x158   : > { %1431 = vst [vmem:[%s1956_s24 + $0x50] sm:$0xff] %v1399_v59 }
 0x159   : > { %1432 = vst [vmem:[%s1956_s24 + $0x58] sm:$0xff] %v1400_v29 }
 0x15a   : > { %1393 = vst [vmem:[#allocation1 + $0x20] ss:$2 sm:$0xff] %v1337_v61 }
 0x15b   : > { %1394 = vst [vmem:[#allocation1 + $0x21] ss:$2 sm:$0xff] %v1341_v41 }
 0x15c   : > { %1395 = vst [vmem:[#allocation1 + $0x30] ss:$2 sm:$0xff] %v1345_v39 }
 0x15d   : > { %1396 = vst [vmem:[#allocation1 + $0x31] ss:$2 sm:$0xff] %v1349_v30 }
 0x162   : > { %v1401_v31 = vld.sshfl [vmem:[#allocation1 + $0x20] sm:$0xff pattern:$0x75316420]  ;;  %v1402_v54 = vld.sshfl [vmem:[#allocation1 + $0x28] sm:$0xff pattern:$0x75316420] }
 0x163   : > { %1433 = vst [vmem:[%s1956_s24 + $0x60] sm:$0xff] %v1401_v31 }
 0x164   : > { %v1403_v32 = vld.sshfl [vmem:[#allocation1 + $0x30] sm:$0xff pattern:$0x75316420]  ;;  %v1404_v55 = vld.sshfl [vmem:[#allocation1 + $0x38] sm:$0xff pattern:$0x75316420] }
 0x165   : > { %1434 = vst [vmem:[%s1956_s24 + $0x68] sm:$0xff] %v1402_v54 }
 0x166   : > { %1435 = vst [vmem:[%s1956_s24 + $0x70] sm:$0xff] %v1403_v32 }
 0x167   : > { %1436 = vst [vmem:[%s1956_s24 + $0x78] sm:$0xff] %v1404_v55 }
 0x168 PF: > { %s16_s20 = sadd.s32 1, %s1685_s20   ;;  %s2039_s18 = smov %s1681_s19 }
 0x169   : > { %p13_p8 = scmp.ge.s32.totalorder %s16_s20, 4   ;;  %s2040_s19 = smov %s2042_s22 }
 0x16b   :  { %15 = sbr.rel (!%p13_p8) target bundleno = 2 (0x2), region = 92 }
 0x170   :  { %1469 = vsyncpa [#allocation3], 1 }
 0x171   :  { %1471 = vsyncpa [#allocation3 + $0x1], 1 }

</bundles_post_ra>
